<compile_context>
chip_gen: v5e
topology: v5e:2x2
jax: 0.10.0
libtpu: 0.0.40
codegen_flags: <defaults>
</compile_context>

<pallas_src>
import functools

import jax
import jax.numpy as jnp
from jax.experimental import pallas as pl
from jax.experimental.pallas import tpu as pltpu


@functools.lru_cache(maxsize=None)
def _vmem_limit(frac=0.75, default=48 * 1024 * 1024):
    """~0.75 x physical VMEM: ~96 MiB on v5e/v6e, ~48 MiB on v7x."""
    try:
        cap = getattr(pltpu.get_tpu_info(), "vmem_capacity_bytes", None)
        if cap:
            return int(frac * cap)
    except Exception:
        pass
    return default


# ---------------------------------------------------------------------------
# Pallas kernel: pointwise (1x1x1) conv as lane-dense  y = W @ x  matmul
# ---------------------------------------------------------------------------
def _pw_conv_kernel(x_ref, w_ref, o_ref):
    # x_ref: (1, Cin, TN) bf16   w_ref: (Cout, Cin) bf16   o_ref: (1, Cout, TN)
    x = x_ref[0].astype(jnp.bfloat16)          # no-op: callers pass bf16
    y = jnp.dot(w_ref[...], x, preferred_element_type=jnp.float32)
    o_ref[0] = y.astype(o_ref.dtype)


def _token_tile(n, max_tile=8192):
    """Largest multiple of 128 that divides n and is <= max_tile; else n."""
    if n % 128 != 0 or n <= max_tile:
        return n
    t = max_tile
    while n % t != 0:
        t -= 128
    return t


def pointwise_conv(x, w, out_dtype=jnp.float32):
    """1x1x1 conv as lane-dense y = W @ x.
    x: (B, Cin, N) tokens-last bf16, w: (Cout, Cin) bf16 -> (B, Cout, N)."""
    B, Cin, N = x.shape
    Cout = w.shape[0]
    Np = N
    if N % 128 != 0:
        # Pad tokens to the next lane multiple: stores stay unmasked/lane-dense
        # and a large non-128-multiple N never falls back to one untiled block.
        Np = ((N + 127) // 128) * 128
        x = jnp.pad(x, ((0, 0), (0, 0), (0, Np - N)))
    tn = _token_tile(Np)
    y = pl.pallas_call(
        _pw_conv_kernel,
        out_shape=jax.ShapeDtypeStruct((B, Cout, Np), out_dtype),
        grid=(B, Np // tn),
        in_specs=[pl.BlockSpec((1, Cin, tn), lambda b, n: (b, 0, n)),
                  pl.BlockSpec((Cout, Cin), lambda b, n: (0, 0))],   # weight stays resident
        out_specs=pl.BlockSpec((1, Cout, tn), lambda b, n: (b, 0, n)),
        compiler_params=pltpu.CompilerParams(
            dimension_semantics=("parallel", "parallel"),
            vmem_limit_bytes=_vmem_limit()),
    )(x, w)
    return y[..., :N] if Np != N else y


# ---------------------------------------------------------------------------
# Pallas kernel: bidirectional attention, grid = (B, heads, Nf-tiles)
# ---------------------------------------------------------------------------
def _biattn_kernel(fqv_ref, mqv_ref, of_ref, om_ref, m_sc, csum_sc, macc_sc, *, nm):
    # fqv_ref: (1, 2, 1, dh, tnf) bf16    mqv_ref: (1, 2, 1, dh, Nm) bf16
    # of_ref:  (1, 1, dh, tnf) bf16       om_ref:  (1, 1, dh, Nm) bf16
    # m_sc: (1,1) f32 running max; csum_sc: (1,Nm) f32; macc_sc: (dh,Nm) f32
    t = pl.program_id(2)
    nt = pl.num_programs(2)

    @pl.when(t == 0)
    def _init():
        m_sc[...] = jnp.full_like(m_sc, -jnp.inf)
        csum_sc[...] = jnp.zeros_like(csum_sc)
        macc_sc[...] = jnp.zeros_like(macc_sc)

    qf = fqv_ref[0, 0, 0]                  # (dh, tnf)  (softmax scale folded into weights)
    vf = fqv_ref[0, 1, 0]                  # (dh, tnf)
    qm = mqv_ref[0, 0, 0]                  # (dh, Nm)
    vm = mqv_ref[0, 1, 0]                  # (dh, Nm)

    # s[i, j] = <qf[:, i], qm[:, j]>
    s = jax.lax.dot_general(qf, qm, (((0,), (0,)), ((), ())),
                            preferred_element_type=jnp.float32)          # (tnf, Nm) f32

    # One running *scalar* max serves BOTH softmax directions: a constant
    # shift cancels in each normalization.
    # TODO(synk): rows/cols whose own max sits >~80 below the global max can
    # underflow to a ~0 sum; fine for well-scaled logits (same as v1).
    m_prev = m_sc[...]                                                   # (1, 1)
    m_new = jnp.maximum(m_prev, jnp.max(s))                              # (1, 1)
    alpha = jnp.exp(m_prev - m_new)                                      # (1, 1); 0 at t==0

    # Single bf16 exp: EUP is the binding unit; bf16 ~doubles EUP throughput
    # on v6e/v7x (extended to f32 where unsupported).  This one bf16 tile
    # feeds every matmul below — no extra (tnf, Nm) casts or multiplies.
    e = jnp.exp((s - m_new).astype(jnp.bfloat16))                        # (tnf, Nm) bf16

    # Row / column sums as M=1 MXU matmuls: lane-major results for free and
    # no VALU/XLU reduction work on the big tile (MXU has slack here).
    ones_nm = jnp.ones((1, nm), jnp.bfloat16)
    ones_tf = jnp.ones((1, e.shape[0]), jnp.bfloat16)
    row_sum = jax.lax.dot_general(ones_nm, e, (((1,), (1,)), ((), ())),
                                  preferred_element_type=jnp.float32)    # (1, tnf)
    col_sum = jax.lax.dot_general(ones_tf, e, (((1,), (0,)), ((), ())),
                                  preferred_element_type=jnp.float32)    # (1, Nm)

    # feat -> map: normalize on the small (dh, tnf) output, not the big tile.
    fo = jax.lax.dot_general(vm, e, (((1,), (1,)), ((), ())),
                             preferred_element_type=jnp.float32)         # (dh, tnf)
    of_ref[0, 0] = (fo * pl.reciprocal(row_sum, approx=True)).astype(of_ref.dtype)

    # map -> feat: flash-style running, rescaled accumulation over feat tiles.
    mo = jax.lax.dot_general(vf, e, (((1,), (0,)), ((), ())),
                             preferred_element_type=jnp.float32)         # (dh, Nm)
    csum_sc[...] = csum_sc[...] * alpha + col_sum
    macc_sc[...] = macc_sc[...] * alpha + mo
    m_sc[...] = m_new

    @pl.when(t == nt - 1)
    def _fin():
        inv_col = pl.reciprocal(csum_sc[...], approx=True)               # (1, Nm)
        om_ref[0, 0] = (macc_sc[...] * inv_col).astype(om_ref.dtype)


def _attn_feat_tile(nf, nm, max_score_bytes=8 << 20):
    """Feat-token tile: largest 128-multiple dividing Nf keeping the (tnf, Nm)
    f32 score tile under ~8 MiB (comfortable within v7x's 64 MiB VMEM)."""
    if nf % 128 != 0:
        return nf
    cap = max(128, (max_score_bytes // (nm * 4)) // 128 * 128)
    t = min(nf, cap)
    while nf % t != 0:
        t -= 128
    return t


def pallas_bidir_attention(fqv, mqv):
    """fqv: (B, 2, H, dh, Nf) bf16, mqv: (B, 2, H, dh, Nm) bf16
    -> feat_o (B, H, dh, Nf) bf16, map_o (B, H, dh, Nm) bf16."""
    B, _, H, dh, Nf = fqv.shape
    Nm = mqv.shape[-1]
    tnf = _attn_feat_tile(Nf, Nm)
    kern = functools.partial(_biattn_kernel, nm=Nm)
    return pl.pallas_call(
        kern,
        out_shape=(jax.ShapeDtypeStruct((B, H, dh, Nf), jnp.bfloat16),
                   jax.ShapeDtypeStruct((B, H, dh, Nm), jnp.bfloat16)),
        grid=(B, H, Nf // tnf),
        in_specs=[pl.BlockSpec((1, 2, 1, dh, tnf), lambda b, h, t: (b, 0, h, 0, t)),
                  pl.BlockSpec((1, 2, 1, dh, Nm), lambda b, h, t: (b, 0, h, 0, 0))],
        out_specs=(pl.BlockSpec((1, 1, dh, tnf), lambda b, h, t: (b, h, 0, t)),
                   pl.BlockSpec((1, 1, dh, Nm), lambda b, h, t: (b, h, 0, 0))),
        scratch_shapes=[pltpu.VMEM((1, 1), jnp.float32),     # running max
                        pltpu.VMEM((1, Nm), jnp.float32),    # running column sums
                        pltpu.VMEM((dh, Nm), jnp.float32)],  # running map accumulation
        compiler_params=pltpu.CompilerParams(
            # batch and heads are parallel (B*H steps keep both v7x cores busy
            # even at B=1); the feat-tile axis is the accumulation axis.
            dimension_semantics=("parallel", "parallel", "arbitrary"),
            vmem_limit_bytes=_vmem_limit()),
    )(fqv, mqv)


# ---------------------------------------------------------------------------
# Glue (plain JAX): depthwise 3x3x3 grouped conv
# ---------------------------------------------------------------------------
# TODO(synk): depthwise 3x3x3 grouped Conv3d kept in XLA (lax.conv); only the
# matmul / attention hot path is implemented in Pallas.
def depthwise_conv3d(x, w):
    """x: (B, C, D, H, W), w: (C, 1, k, k, k), stride 1, 'same' padding."""
    k = w.shape[-1]
    pad = k // 2
    return jax.lax.conv_general_dilated(
        x, w.astype(x.dtype), window_strides=(1, 1, 1), padding=[(pad, pad)] * 3,
        dimension_numbers=("NCDHW", "OIDHW", "NCDHW"),
        feature_group_count=x.shape[1])


# ---------------------------------------------------------------------------
# Full forward (proj_type='depthwise'); attn_drop = proj_drop = 0 -> identity
# ---------------------------------------------------------------------------
def bidirection_attention(feat, smap, params, *, heads, dim_head, map_size):
    B, C, D, H, W = feat.shape
    inner = heads * dim_head
    scale = dim_head ** (-0.5)
    md, mh, mw = map_size
    Nf, Nm = D * H * W, md * mh * mw
    Cm = smap.shape[1]

    # --- trace-time weight reordering: absorb all head-split/merge rearranges
    # (and the softmax scale) into the tiny weights so activations are never
    # transposed in HBM between kernels — only free contiguous reshapes.
    def qv_rows(w, q_scale=None):   # rows (qv, dim_head, heads) -> (qv, heads, dim_head)
        cin = w.shape[1]
        w4 = w.reshape(2, dim_head, heads, cin)
        if q_scale is not None:
            w4 = w4.at[0].multiply(q_scale)      # fold softmax scale into f32 q-weights
        return w4.transpose(0, 2, 1, 3).reshape(2 * inner, cin)

    def out_cols(w):                # columns (dim_head, heads) -> (heads, dim_head)
        cout = w.shape[0]
        return w.reshape(cout, dim_head, heads).transpose(0, 2, 1).reshape(cout, inner)

    def dw_chans(w):                # channels (dim_head, heads) -> (heads, dim_head)
        return w.reshape(dim_head, heads, *w.shape[1:]).transpose(1, 0, 2, 3, 4, 5).reshape(w.shape)

    w_feat_qv = qv_rows(params["feat_qv_pw"], q_scale=scale).astype(jnp.bfloat16)
    w_map_qv = qv_rows(params["map_qv_w"]).astype(jnp.bfloat16)
    w_feat_out = out_cols(params["feat_out_pw"]).astype(jnp.bfloat16)
    w_map_out = out_cols(params["map_out_w"]).astype(jnp.bfloat16)
    dw_feat_out = dw_chans(params["feat_out_dw"])

    # --- qv projections (tokens-last, bf16 activations end-to-end) ---
    f_dw = depthwise_conv3d(feat, params["feat_qv_dw"])                            # (B, C, D,H,W) f32
    fqv = pointwise_conv(f_dw.reshape(B, C, Nf).astype(jnp.bfloat16),
                         w_feat_qv, jnp.bfloat16)                                  # (B, 2*inner, Nf)
    mqv = pointwise_conv(smap.reshape(B, Cm, Nm).astype(jnp.bfloat16),
                         w_map_qv, jnp.bfloat16)                                   # (B, 2*inner, Nm)

    fqv = fqv.reshape(B, 2, heads, dim_head, Nf)     # contiguous splits: free reshapes
    mqv = mqv.reshape(B, 2, heads, dim_head, Nm)

    # --- bidirectional attention (bf16 outputs) ---
    feat_o, map_o = pallas_bidir_attention(fqv, mqv)          # (B, H, dh, N) bf16

    # --- output projections: channel order is (heads, dim_head); weights permuted.
    #     The whole feat chain stays bf16 (halves HBM traffic on the BW-bound convs).
    feat_o = feat_o.reshape(B, inner, D, H, W)
    fo_dw = depthwise_conv3d(feat_o, dw_feat_out)                                  # bf16
    feat_out = pointwise_conv(fo_dw.reshape(B, inner, Nf), w_feat_out, jnp.float32)
    feat_out = feat_out.reshape(B, -1, D, H, W)

    map_out = pointwise_conv(map_o.reshape(B, inner, Nm), w_map_out, jnp.float32)
    map_out = map_out.reshape(B, -1, md, mh, mw)
    # attn_drop / proj_drop with p=0 are identity.
    return feat_out, map_out


# ---------------------------------------------------------------------------
# Pure-JAX f32 reference (original layout / raw weights) for correctness check
# ---------------------------------------------------------------------------
def split_heads(x, heads, dim_head, d, h, w):
    B = x.shape[0]
    x = x.reshape(B, dim_head, heads, d, h, w)
    x = x.transpose(0, 2, 3, 4, 5, 1)
    return x.reshape(B, heads, d * h * w, dim_head)


def merge_heads(x, d, h, w):
    B, heads, _, dim_head = x.shape
    x = x.reshape(B, heads, d, h, w, dim_head)
    x = x.transpose(0, 5, 1, 2, 3, 4)
    return x.reshape(B, dim_head * heads, d, h, w)


def reference(feat, smap, params, *, heads, dim_head, map_size):
    B, C, D, H, W = feat.shape
    inner = heads * dim_head
    scale = dim_head ** (-0.5)
    md, mh, mw = map_size

    def pw(x, w):
        return jnp.einsum("bcdhw,oc->bodhw", x, w)

    fqv = pw(depthwise_conv3d(feat, params["feat_qv_dw"]), params["feat_qv_pw"])
    mqv = pw(smap, params["map_qv_w"])
    feat_q, feat_v = fqv[:, :inner], fqv[:, inner:]
    map_q, map_v = mqv[:, :inner], mqv[:, inner:]
    feat_q = split_heads(feat_q, heads, dim_head, D, H, W)
    feat_v = split_heads(feat_v, heads, dim_head, D, H, W)
    map_q = split_heads(map_q, heads, dim_head, md, mh, mw)
    map_v = split_heads(map_v, heads, dim_head, md, mh, mw)

    attn = jnp.einsum("bhid,bhjd->bhij", feat_q, map_q) * scale
    a_fm = jax.nn.softmax(attn, axis=-1)
    a_mf = jax.nn.softmax(attn, axis=-2)
    feat_o = jnp.einsum("bhij,bhjd->bhid", a_fm, map_v)
    map_o = jnp.einsum("bhji,bhjd->bhid", a_mf, feat_v)

    feat_o = merge_heads(feat_o, D, H, W)
    map_o = merge_heads(map_o, md, mh, mw)
    feat_out = pw(depthwise_conv3d(feat_o, params["feat_out_dw"]),
                  params["feat_out_pw"])
    map_out = pw(map_o, params["map_out_w"])
    return feat_out, map_out


# ---------------------------------------------------------------------------
if __name__ == "__main__":
    key = jax.random.PRNGKey(0)
    ks = jax.random.split(key, 8)

    B, feat_dim, D, H, W = 2, 4, 8, 8, 8
    map_dim = 3
    map_size = (4, 4, 4)
    heads, dim_head = 2, 16
    out_dim = 8
    inner = heads * dim_head

    feat = jax.random.normal(ks[0], (B, feat_dim, D, H, W), jnp.float32)
    smap = jax.random.normal(ks[1], (B, map_dim) + map_size, jnp.float32)

    params = dict(
        feat_qv_dw=0.1 * jax.random.normal(ks[2], (feat_dim, 1, 3, 3, 3), jnp.float32),
        feat_qv_pw=0.1 * jax.random.normal(ks[3], (2 * inner, feat_dim), jnp.float32),
        map_qv_w=0.1 * jax.random.normal(ks[4], (2 * inner, map_dim), jnp.float32),
        feat_out_dw=0.1 * jax.random.normal(ks[5], (inner, 1, 3, 3, 3), jnp.float32),
        feat_out_pw=0.1 * jax.random.normal(ks[6], (out_dim, inner), jnp.float32),
        map_out_w=0.1 * jax.random.normal(ks[7], (map_dim, inner), jnp.float32),
    )

    fwd = jax.jit(functools.partial(bidirection_attention, heads=heads,
                                    dim_head=dim_head, map_size=map_size))
    feat_out, map_out = fwd(feat, smap, params)
    jax.block_until_ready((feat_out, map_out))

    ref_f, ref_m = reference(feat, smap, params, heads=heads, dim_head=dim_head,
                             map_size=map_size)
    assert feat_out.shape == (B, out_dim, D, H, W)
    assert map_out.shape == (B, map_dim) + map_size
    # bf16 operands / activations (f32 accumulation) + approx reciprocal
    # -> relaxed tolerance vs. the f32 reference.
    assert jnp.allclose(feat_out, ref_f, atol=2e-2, rtol=2e-2), (
        "feat max err", float(jnp.max(jnp.abs(feat_out - ref_f))))
    assert jnp.allclose(map_out, ref_m, atol=2e-2, rtol=2e-2), (
        "map max err", float(jnp.max(jnp.abs(map_out - ref_m))))
    print("KERNEL_OK")
</pallas_src>

<mosaic_0001>
module attributes {stable_mosaic.version = 11 : i64} {
  func.func @_pw_conv_kernel(%arg0: i32, %arg1: i32, %arg2: memref<1x4x512xbf16, #tpu.memory_space<vmem>>, %arg3: memref<64x4xbf16, #tpu.memory_space<vmem>>, %arg4: memref<1x64x512xbf16, #tpu.memory_space<vmem>>) attributes {dimension_semantics = [#tpu.dimension_semantics<parallel>, #tpu.dimension_semantics<parallel>], iteration_bounds = array<i64: 2, 1>, scalar_prefetch = 0 : i64, scratch_operands = 0 : i64, tpu.core_type = #tpu.core_type<tc>, window_params = [{transform_indices = @transform_0, window_bounds = array<i64: 1, 4, 512>}, {pipeline_mode = #tpu.pipeline_mode<synchronous>, transform_indices = @transform_1, window_bounds = array<i64: 64, 4>}, {transform_indices = @transform_2, window_bounds = array<i64: 1, 64, 512>}]} {
    %c0 = arith.constant 0 : index
    %c0_0 = arith.constant 0 : index
    %c0_1 = arith.constant 0 : index
    %0 = vector.load %arg2[%c0, %c0_0, %c0_1] : memref<1x4x512xbf16, #tpu.memory_space<vmem>>, vector<1x4x512xbf16>
    %1 = vector.shape_cast %0 : vector<1x4x512xbf16> to vector<4x512xbf16>
    %c0_2 = arith.constant 0 : index
    %c0_3 = arith.constant 0 : index
    %2 = vector.load %arg3[%c0_2, %c0_3] : memref<64x4xbf16, #tpu.memory_space<vmem>>, vector<64x4xbf16>
    %cst = arith.constant dense<0.000000e+00> : vector<64x512xf32>
    %3 = tpu.matmul %2, %1, %cst {dimension_numbers = #tpu.dot_dimension_numbers<[1], [0], [0], [1], [0, 0, 1, 1], [], []>} : vector<64x4xbf16>, vector<4x512xbf16>, vector<64x512xf32> -> vector<64x512xf32>
    %4 = arith.truncf %3 : vector<64x512xf32> to vector<64x512xbf16>
    %c0_4 = arith.constant 0 : index
    %c0_5 = arith.constant 0 : index
    %c0_6 = arith.constant 0 : index
    %5 = vector.load %arg4[%c0_4, %c0_5, %c0_6] : memref<1x64x512xbf16, #tpu.memory_space<vmem>>, vector<1x64x512xbf16>
    %6 = vector.shape_cast %5 : vector<1x64x512xbf16> to vector<64x512xbf16>
    %7 = vector.shape_cast %4 : vector<64x512xbf16> to vector<1x64x512xbf16>
    tpu.vector_store %arg4[%c0_4, %c0_5, %c0_6], %7 {strides = array<i32>} : memref<1x64x512xbf16, #tpu.memory_space<vmem>>, vector<1x64x512xbf16>,
    return
  }
  func.func @transform_0(%arg0: i32, %arg1: i32) -> (i32, i32, i32) {
    %c0_i32 = arith.constant 0 : i32
    %c0_i32_0 = arith.constant 0 : i32
    return %arg0, %c0_i32, %arg1 : i32, i32, i32
  }
  func.func @transform_1(%arg0: i32, %arg1: i32) -> (i32, i32) {
    %c0_i32 = arith.constant 0 : i32
    %c0_i32_0 = arith.constant 0 : i32
    %c0_i32_1 = arith.constant 0 : i32
    return %c0_i32, %c0_i32_0 : i32, i32
  }
  func.func @transform_2(%arg0: i32, %arg1: i32) -> (i32, i32, i32) {
    %c0_i32 = arith.constant 0 : i32
    %c0_i32_0 = arith.constant 0 : i32
    return %arg0, %c0_i32, %arg1 : i32, i32, i32
  }
}

module attributes {stable_mosaic.version = 11 : i64} {
  func.func @_biattn_kernel(%arg0: i32, %arg1: i32, %arg2: i32, %arg3: memref<1x2x1x16x512xbf16, #tpu.memory_space<vmem>>, %arg4: memref<1x2x1x16x64xbf16, #tpu.memory_space<vmem>>, %arg5: memref<1x1x16x512xbf16, #tpu.memory_space<vmem>>, %arg6: memref<1x1x16x64xbf16, #tpu.memory_space<vmem>>, %arg7: memref<1x1xf32, #tpu.memory_space<vmem>>, %arg8: memref<1x64xf32, #tpu.memory_space<vmem>>, %arg9: memref<16x64xf32, #tpu.memory_space<vmem>>) attributes {dimension_semantics = [#tpu.dimension_semantics<parallel>, #tpu.dimension_semantics<parallel>, #tpu.dimension_semantics<arbitrary>], iteration_bounds = array<i64: 2, 2, 1>, scalar_prefetch = 0 : i64, scratch_operands = 3 : i64, tpu.core_type = #tpu.core_type<tc>, window_params = [{transform_indices = @transform_0, window_bounds = array<i64: 1, 2, 1, 16, 512>}, {transform_indices = @transform_1, window_bounds = array<i64: 1, 2, 1, 16, 64>}, {transform_indices = @transform_2, window_bounds = array<i64: 1, 1, 16, 512>}, {transform_indices = @transform_3, window_bounds = array<i64: 1, 1, 16, 64>}]} {
    %c0_i32 = arith.constant 0 : i32
    %0 = arith.cmpi eq, %arg2, %c0_i32 : i32
    %1 = arith.extui %0 : i1 to i32
    %c0_i32_0 = arith.constant 0 : i32
    %2 = arith.cmpi ne, %1, %c0_i32_0 : i32
    scf.if %2 {
      %cst_44 = arith.constant 0xFF800000 : f32
      %52 = vector.broadcast %cst_44 : f32 to vector<1x1xf32>
      %c0_45 = arith.constant 0 : index
      %c0_46 = arith.constant 0 : index
      %53 = vector.load %arg7[%c0_45, %c0_46] : memref<1x1xf32, #tpu.memory_space<vmem>>, vector<1x1xf32>
      tpu.vector_store %arg7[%c0_45, %c0_46], %52 {strides = array<i32>} : memref<1x1xf32, #tpu.memory_space<vmem>>, vector<1x1xf32>,
      %cst_47 = arith.constant 0.000000e+00 : f32
      %54 = vector.broadcast %cst_47 : f32 to vector<1x64xf32>
      %c0_48 = arith.constant 0 : index
      %c0_49 = arith.constant 0 : index
      %55 = vector.load %arg8[%c0_48, %c0_49] : memref<1x64xf32, #tpu.memory_space<vmem>>, vector<1x64xf32>
      tpu.vector_store %arg8[%c0_48, %c0_49], %54 {strides = array<i32>} : memref<1x64xf32, #tpu.memory_space<vmem>>, vector<1x64xf32>,
      %cst_50 = arith.constant 0.000000e+00 : f32
      %56 = vector.broadcast %cst_50 : f32 to vector<16x64xf32>
      %c0_51 = arith.constant 0 : index
      %c0_52 = arith.constant 0 : index
      %57 = vector.load %arg9[%c0_51, %c0_52] : memref<16x64xf32, #tpu.memory_space<vmem>>, vector<16x64xf32>
      tpu.vector_store %arg9[%c0_51, %c0_52], %56 {strides = array<i32>} : memref<16x64xf32, #tpu.memory_space<vmem>>, vector<16x64xf32>,
    } else {
    }
    %c0 = arith.constant 0 : index
    %c0_1 = arith.constant 0 : index
    %c0_2 = arith.constant 0 : index
    %c0_3 = arith.constant 0 : index
    %c0_4 = arith.constant 0 : index
    %3 = vector.load %arg3[%c0, %c0_1, %c0_2, %c0_3, %c0_4] : memref<1x2x1x16x512xbf16, #tpu.memory_space<vmem>>, vector<1x1x1x16x512xbf16>
    %4 = vector.shape_cast %3 : vector<1x1x1x16x512xbf16> to vector<16x512xbf16>
    %c0_5 = arith.constant 0 : index
    %c1 = arith.constant 1 : index
    %c0_6 = arith.constant 0 : index
    %c0_7 = arith.constant 0 : index
    %c0_8 = arith.constant 0 : index
    %5 = vector.load %arg3[%c0_5, %c1, %c0_6, %c0_7, %c0_8] : memref<1x2x1x16x512xbf16, #tpu.memory_space<vmem>>, vector<1x1x1x16x512xbf16>
    %6 = vector.shape_cast %5 : vector<1x1x1x16x512xbf16> to vector<16x512xbf16>
    %c0_9 = arith.constant 0 : index
    %c0_10 = arith.constant 0 : index
    %c0_11 = arith.constant 0 : index
    %c0_12 = arith.constant 0 : index
    %c0_13 = arith.constant 0 : index
    %7 = vector.load %arg4[%c0_9, %c0_10, %c0_11, %c0_12, %c0_13] : memref<1x2x1x16x64xbf16, #tpu.memory_space<vmem>>, vector<1x1x1x16x64xbf16>
    %8 = vector.shape_cast %7 : vector<1x1x1x16x64xbf16> to vector<16x64xbf16>
    %c0_14 = arith.constant 0 : index
    %c1_15 = arith.constant 1 : index
    %c0_16 = arith.constant 0 : index
    %c0_17 = arith.constant 0 : index
    %c0_18 = arith.constant 0 : index
    %9 = vector.load %arg4[%c0_14, %c1_15, %c0_16, %c0_17, %c0_18] : memref<1x2x1x16x64xbf16, #tpu.memory_space<vmem>>, vector<1x1x1x16x64xbf16>
    %10 = vector.shape_cast %9 : vector<1x1x1x16x64xbf16> to vector<16x64xbf16>
    %cst = arith.constant dense<0.000000e+00> : vector<512x64xf32>
    %11 = tpu.matmul %4, %8, %cst {dimension_numbers = #tpu.dot_dimension_numbers<[0], [0], [1], [1], [0, 1, 1, 1], [], []>} : vector<16x512xbf16>, vector<16x64xbf16>, vector<512x64xf32> -> vector<512x64xf32>
    %c0_19 = arith.constant 0 : index
    %c0_20 = arith.constant 0 : index
    %12 = vector.load %arg7[%c0_19, %c0_20] : memref<1x1xf32, #tpu.memory_space<vmem>>, vector<1x1xf32>
    %13 = vector.shape_cast %11 : vector<512x64xf32> to vector<1x512x64xf32>
    %cst_21 = arith.constant dense<0xFF800000> : vector<1xf32>
    %14 = vector.multi_reduction <maximumf>, %13, %cst_21 [1, 2] : vector<1x512x64xf32> to vector<1xf32>
    %15 = vector.shape_cast %14 : vector<1xf32> to vector<1x1x1xf32>
    %16 = vector.extract %15[0, 0, 0] : f32 from vector<1x1x1xf32>
    %17 = vector.broadcast %16 : f32 to vector<1x1xf32>
    %18 = arith.maximumf %12, %17 : vector<1x1xf32>
    %19 = arith.subf %12, %18 : vector<1x1xf32>
    %20 = math.exp %19 : vector<1x1xf32>
    %21 = vector.broadcast %18 : vector<1x1xf32> to vector<512x64xf32>
    %22 = arith.subf %11, %21 : vector<512x64xf32>
    %23 = arith.truncf %22 : vector<512x64xf32> to vector<512x64xbf16>
    %24 = math.exp %23 : vector<512x64xbf16>
    %cst_22 = arith.constant 1.000000e+00 : bf16
    %25 = vector.broadcast %cst_22 : bf16 to vector<1x64xbf16>
    %cst_23 = arith.constant 1.000000e+00 : bf16
    %26 = vector.broadcast %cst_23 : bf16 to vector<1x512xbf16>
    %cst_24 = arith.constant dense<0.000000e+00> : vector<1x512xf32>
    %27 = tpu.matmul %25, %24, %cst_24 {dimension_numbers = #tpu.dot_dimension_numbers<[1], [1], [0], [0], [0, 0, 1, 0], [], []>} : vector<1x64xbf16>, vector<512x64xbf16>, vector<1x512xf32> -> vector<1x512xf32>
    %cst_25 = arith.constant dense<0.000000e+00> : vector<1x64xf32>
    %28 = tpu.matmul %26, %24, %cst_25 {dimension_numbers = #tpu.dot_dimension_numbers<[1], [0], [0], [1], [0, 0, 1, 1], [], []>} : vector<1x512xbf16>, vector<512x64xbf16>, vector<1x64xf32> -> vector<1x64xf32>
    %cst_26 = arith.constant dense<0.000000e+00> : vector<16x512xf32>
    %29 = tpu.matmul %10, %24, %cst_26 {dimension_numbers = #tpu.dot_dimension_numbers<[1], [1], [0], [0], [0, 0, 1, 0], [], []>} : vector<16x64xbf16>, vector<512x64xbf16>, vector<16x512xf32> -> vector<16x512xf32>
    %30 = tpu.reciprocal %27 {approx = true} : vector<1x512xf32> -> vector<1x512xf32>
    %31 = vector.broadcast %30 : vector<1x512xf32> to vector<16x512xf32>
    %32 = arith.mulf %29, %31 : vector<16x512xf32>
    %33 = arith.truncf %32 : vector<16x512xf32> to vector<16x512xbf16>
    %c0_27 = arith.constant 0 : index
    %c0_28 = arith.constant 0 : index
    %c0_29 = arith.constant 0 : index
    %c0_30 = arith.constant 0 : index
    %34 = vector.load %arg5[%c0_27, %c0_28, %c0_29, %c0_30] : memref<1x1x16x512xbf16, #tpu.memory_space<vmem>>, vector<1x1x16x512xbf16>
    %35 = vector.shape_cast %34 : vector<1x1x16x512xbf16> to vector<16x512xbf16>
    %36 = vector.shape_cast %33 : vector<16x512xbf16> to vector<1x1x16x512xbf16>
    tpu.vector_store %arg5[%c0_27, %c0_28, %c0_29, %c0_30], %36 {strides = array<i32>} : memref<1x1x16x512xbf16, #tpu.memory_space<vmem>>, vector<1x1x16x512xbf16>,
    %cst_31 = arith.constant dense<0.000000e+00> : vector<16x64xf32>
    %37 = tpu.matmul %6, %24, %cst_31 {dimension_numbers = #tpu.dot_dimension_numbers<[1], [0], [0], [1], [0, 0, 1, 1], [], []>} : vector<16x512xbf16>, vector<512x64xbf16>, vector<16x64xf32> -> vector<16x64xf32>
    %c0_32 = arith.constant 0 : index
    %c0_33 = arith.constant 0 : index
    %38 = vector.load %arg8[%c0_32, %c0_33] : memref<1x64xf32, #tpu.memory_space<vmem>>, vector<1x64xf32>
    %39 = vector.broadcast %20 : vector<1x1xf32> to vector<1x64xf32>
    %40 = arith.mulf %38, %39 : vector<1x64xf32>
    %41 = arith.addf %40, %28 : vector<1x64xf32>
    %c0_34 = arith.constant 0 : index
    %c0_35 = arith.constant 0 : index
    %42 = vector.load %arg8[%c0_34, %c0_35] : memref<1x64xf32, #tpu.memory_space<vmem>>, vector<1x64xf32>
    tpu.vector_store %arg8[%c0_34, %c0_35], %41 {strides = array<i32>} : memref<1x64xf32, #tpu.memory_space<vmem>>, vector<1x64xf32>,
    %c0_36 = arith.constant 0 : index
    %c0_37 = arith.constant 0 : index
    %43 = vector.load %arg9[%c0_36, %c0_37] : memref<16x64xf32, #tpu.memory_space<vmem>>, vector<16x64xf32>
    %44 = vector.broadcast %20 : vector<1x1xf32> to vector<16x64xf32>
    %45 = arith.mulf %43, %44 : vector<16x64xf32>
    %46 = arith.addf %45, %37 : vector<16x64xf32>
    %c0_38 = arith.constant 0 : index
    %c0_39 = arith.constant 0 : index
    %47 = vector.load %arg9[%c0_38, %c0_39] : memref<16x64xf32, #tpu.memory_space<vmem>>, vector<16x64xf32>
    tpu.vector_store %arg9[%c0_38, %c0_39], %46 {strides = array<i32>} : memref<16x64xf32, #tpu.memory_space<vmem>>, vector<16x64xf32>,
    %c0_40 = arith.constant 0 : index
    %c0_41 = arith.constant 0 : index
    %48 = vector.load %arg7[%c0_40, %c0_41] : memref<1x1xf32, #tpu.memory_space<vmem>>, vector<1x1xf32>
    tpu.vector_store %arg7[%c0_40, %c0_41], %18 {strides = array<i32>} : memref<1x1xf32, #tpu.memory_space<vmem>>, vector<1x1xf32>,
    %c0_i32_42 = arith.constant 0 : i32
    %49 = arith.cmpi eq, %arg2, %c0_i32_42 : i32
    %50 = arith.extui %49 : i1 to i32
    %c0_i32_43 = arith.constant 0 : i32
    %51 = arith.cmpi ne, %50, %c0_i32_43 : i32
    scf.if %51 {
      %c0_44 = arith.constant 0 : index
      %c0_45 = arith.constant 0 : index
      %52 = vector.load %arg8[%c0_44, %c0_45] : memref<1x64xf32, #tpu.memory_space<vmem>>, vector<1x64xf32>
      %53 = tpu.reciprocal %52 {approx = true} : vector<1x64xf32> -> vector<1x64xf32>
      %c0_46 = arith.constant 0 : index
      %c0_47 = arith.constant 0 : index
      %54 = vector.load %arg9[%c0_46, %c0_47] : memref<16x64xf32, #tpu.memory_space<vmem>>, vector<16x64xf32>
      %55 = vector.broadcast %53 : vector<1x64xf32> to vector<16x64xf32>
      %56 = arith.mulf %54, %55 : vector<16x64xf32>
      %57 = arith.truncf %56 : vector<16x64xf32> to vector<16x64xbf16>
      %c0_48 = arith.constant 0 : index
      %c0_49 = arith.constant 0 : index
      %c0_50 = arith.constant 0 : index
      %c0_51 = arith.constant 0 : index
      %58 = vector.load %arg6[%c0_48, %c0_49, %c0_50, %c0_51] : memref<1x1x16x64xbf16, #tpu.memory_space<vmem>>, vector<1x1x16x64xbf16>
      %59 = vector.shape_cast %58 : vector<1x1x16x64xbf16> to vector<16x64xbf16>
      %60 = vector.shape_cast %57 : vector<16x64xbf16> to vector<1x1x16x64xbf16>
      tpu.vector_store %arg6[%c0_48, %c0_49, %c0_50, %c0_51], %60 {strides = array<i32>} : memref<1x1x16x64xbf16, #tpu.memory_space<vmem>>, vector<1x1x16x64xbf16>,
    } else {
    }
    return
  }
  func.func @transform_0(%arg0: i32, %arg1: i32, %arg2: i32) -> (i32, i32, i32, i32, i32) {
    %c0_i32 = arith.constant 0 : i32
    %c0_i32_0 = arith.constant 0 : i32
    %c0_i32_1 = arith.constant 0 : i32
    return %arg0, %c0_i32, %arg1, %c0_i32_0, %arg2 : i32, i32, i32, i32, i32
  }
  func.func @transform_1(%arg0: i32, %arg1: i32, %arg2: i32) -> (i32, i32, i32, i32, i32) {
    %c0_i32 = arith.constant 0 : i32
    %c0_i32_0 = arith.constant 0 : i32
    %c0_i32_1 = arith.constant 0 : i32
    %c0_i32_2 = arith.constant 0 : i32
    return %arg0, %c0_i32, %arg1, %c0_i32_0, %c0_i32_1 : i32, i32, i32, i32, i32
  }
  func.func @transform_2(%arg0: i32, %arg1: i32, %arg2: i32) -> (i32, i32, i32, i32) {
    %c0_i32 = arith.constant 0 : i32
    %c0_i32_0 = arith.constant 0 : i32
    return %arg0, %arg1, %c0_i32, %arg2 : i32, i32, i32, i32
  }
  func.func @transform_3(%arg0: i32, %arg1: i32, %arg2: i32) -> (i32, i32, i32, i32) {
    %c0_i32 = arith.constant 0 : i32
    %c0_i32_0 = arith.constant 0 : i32
    %c0_i32_1 = arith.constant 0 : i32
    return %arg0, %arg1, %c0_i32, %c0_i32_0 : i32, i32, i32, i32
  }
}

module attributes {stable_mosaic.version = 11 : i64} {
  func.func @_pw_conv_kernel(%arg0: i32, %arg1: i32, %arg2: memref<1x3x128xbf16, #tpu.memory_space<vmem>>, %arg3: memref<64x3xbf16, #tpu.memory_space<vmem>>, %arg4: memref<1x64x128xbf16, #tpu.memory_space<vmem>>) attributes {dimension_semantics = [#tpu.dimension_semantics<parallel>, #tpu.dimension_semantics<parallel>], iteration_bounds = array<i64: 2, 1>, scalar_prefetch = 0 : i64, scratch_operands = 0 : i64, tpu.core_type = #tpu.core_type<tc>, window_params = [{transform_indices = @transform_0, window_bounds = array<i64: 1, 3, 128>}, {pipeline_mode = #tpu.pipeline_mode<synchronous>, transform_indices = @transform_1, window_bounds = array<i64: 64, 3>}, {transform_indices = @transform_2, window_bounds = array<i64: 1, 64, 128>}]} {
    %c0 = arith.constant 0 : index
    %c0_0 = arith.constant 0 : index
    %c0_1 = arith.constant 0 : index
    %0 = vector.load %arg2[%c0, %c0_0, %c0_1] : memref<1x3x128xbf16, #tpu.memory_space<vmem>>, vector<1x3x128xbf16>
    %1 = vector.shape_cast %0 : vector<1x3x128xbf16> to vector<3x128xbf16>
    %c0_2 = arith.constant 0 : index
    %c0_3 = arith.constant 0 : index
    %2 = vector.load %arg3[%c0_2, %c0_3] : memref<64x3xbf16, #tpu.memory_space<vmem>>, vector<64x3xbf16>
    %cst = arith.constant dense<0.000000e+00> : vector<64x128xf32>
    %3 = tpu.matmul %2, %1, %cst {dimension_numbers = #tpu.dot_dimension_numbers<[1], [0], [0], [1], [0, 0, 1, 1], [], []>} : vector<64x3xbf16>, vector<3x128xbf16>, vector<64x128xf32> -> vector<64x128xf32>
    %4 = arith.truncf %3 : vector<64x128xf32> to vector<64x128xbf16>
    %c0_4 = arith.constant 0 : index
    %c0_5 = arith.constant 0 : index
    %c0_6 = arith.constant 0 : index
    %5 = vector.load %arg4[%c0_4, %c0_5, %c0_6] : memref<1x64x128xbf16, #tpu.memory_space<vmem>>, vector<1x64x128xbf16>
    %6 = vector.shape_cast %5 : vector<1x64x128xbf16> to vector<64x128xbf16>
    %7 = vector.shape_cast %4 : vector<64x128xbf16> to vector<1x64x128xbf16>
    tpu.vector_store %arg4[%c0_4, %c0_5, %c0_6], %7 {strides = array<i32>} : memref<1x64x128xbf16, #tpu.memory_space<vmem>>, vector<1x64x128xbf16>,
    return
  }
  func.func @transform_0(%arg0: i32, %arg1: i32) -> (i32, i32, i32) {
    %c0_i32 = arith.constant 0 : i32
    %c0_i32_0 = arith.constant 0 : i32
    return %arg0, %c0_i32, %arg1 : i32, i32, i32
  }
  func.func @transform_1(%arg0: i32, %arg1: i32) -> (i32, i32) {
    %c0_i32 = arith.constant 0 : i32
    %c0_i32_0 = arith.constant 0 : i32
    %c0_i32_1 = arith.constant 0 : i32
    return %c0_i32, %c0_i32_0 : i32, i32
  }
  func.func @transform_2(%arg0: i32, %arg1: i32) -> (i32, i32, i32) {
    %c0_i32 = arith.constant 0 : i32
    %c0_i32_0 = arith.constant 0 : i32
    return %arg0, %c0_i32, %arg1 : i32, i32, i32
  }
}

module attributes {stable_mosaic.version = 11 : i64} {
  func.func @_pw_conv_kernel(%arg0: i32, %arg1: i32, %arg2: memref<1x32x512xbf16, #tpu.memory_space<vmem>>, %arg3: memref<8x32xbf16, #tpu.memory_space<vmem>>, %arg4: memref<1x8x512xf32, #tpu.memory_space<vmem>>) attributes {dimension_semantics = [#tpu.dimension_semantics<parallel>, #tpu.dimension_semantics<parallel>], iteration_bounds = array<i64: 2, 1>, scalar_prefetch = 0 : i64, scratch_operands = 0 : i64, tpu.core_type = #tpu.core_type<tc>, window_params = [{transform_indices = @transform_0, window_bounds = array<i64: 1, 32, 512>}, {pipeline_mode = #tpu.pipeline_mode<synchronous>, transform_indices = @transform_1, window_bounds = array<i64: 8, 32>}, {transform_indices = @transform_2, window_bounds = array<i64: 1, 8, 512>}]} {
    %c0 = arith.constant 0 : index
    %c0_0 = arith.constant 0 : index
    %c0_1 = arith.constant 0 : index
    %0 = vector.load %arg2[%c0, %c0_0, %c0_1] : memref<1x32x512xbf16, #tpu.memory_space<vmem>>, vector<1x32x512xbf16>
    %1 = vector.shape_cast %0 : vector<1x32x512xbf16> to vector<32x512xbf16>
    %c0_2 = arith.constant 0 : index
    %c0_3 = arith.constant 0 : index
    %2 = vector.load %arg3[%c0_2, %c0_3] : memref<8x32xbf16, #tpu.memory_space<vmem>>, vector<8x32xbf16>
    %cst = arith.constant dense<0.000000e+00> : vector<8x512xf32>
    %3 = tpu.matmul %2, %1, %cst {dimension_numbers = #tpu.dot_dimension_numbers<[1], [0], [0], [1], [0, 0, 1, 1], [], []>} : vector<8x32xbf16>, vector<32x512xbf16>, vector<8x512xf32> -> vector<8x512xf32>
    %c0_4 = arith.constant 0 : index
    %c0_5 = arith.constant 0 : index
    %c0_6 = arith.constant 0 : index
    %4 = vector.load %arg4[%c0_4, %c0_5, %c0_6] : memref<1x8x512xf32, #tpu.memory_space<vmem>>, vector<1x8x512xf32>
    %5 = vector.shape_cast %4 : vector<1x8x512xf32> to vector<8x512xf32>
    %6 = vector.shape_cast %3 : vector<8x512xf32> to vector<1x8x512xf32>
    tpu.vector_store %arg4[%c0_4, %c0_5, %c0_6], %6 {strides = array<i32>} : memref<1x8x512xf32, #tpu.memory_space<vmem>>, vector<1x8x512xf32>,
    return
  }
  func.func @transform_0(%arg0: i32, %arg1: i32) -> (i32, i32, i32) {
    %c0_i32 = arith.constant 0 : i32
    %c0_i32_0 = arith.constant 0 : i32
    return %arg0, %c0_i32, %arg1 : i32, i32, i32
  }
  func.func @transform_1(%arg0: i32, %arg1: i32) -> (i32, i32) {
    %c0_i32 = arith.constant 0 : i32
    %c0_i32_0 = arith.constant 0 : i32
    %c0_i32_1 = arith.constant 0 : i32
    return %c0_i32, %c0_i32_0 : i32, i32
  }
  func.func @transform_2(%arg0: i32, %arg1: i32) -> (i32, i32, i32) {
    %c0_i32 = arith.constant 0 : i32
    %c0_i32_0 = arith.constant 0 : i32
    return %arg0, %c0_i32, %arg1 : i32, i32, i32
  }
}

module attributes {stable_mosaic.version = 11 : i64} {
  func.func @_pw_conv_kernel(%arg0: i32, %arg1: i32, %arg2: memref<1x32x128xbf16, #tpu.memory_space<vmem>>, %arg3: memref<3x32xbf16, #tpu.memory_space<vmem>>, %arg4: memref<1x3x128xf32, #tpu.memory_space<vmem>>) attributes {dimension_semantics = [#tpu.dimension_semantics<parallel>, #tpu.dimension_semantics<parallel>], iteration_bounds = array<i64: 2, 1>, scalar_prefetch = 0 : i64, scratch_operands = 0 : i64, tpu.core_type = #tpu.core_type<tc>, window_params = [{transform_indices = @transform_0, window_bounds = array<i64: 1, 32, 128>}, {pipeline_mode = #tpu.pipeline_mode<synchronous>, transform_indices = @transform_1, window_bounds = array<i64: 3, 32>}, {transform_indices = @transform_2, window_bounds = array<i64: 1, 3, 128>}]} {
    %c0 = arith.constant 0 : index
    %c0_0 = arith.constant 0 : index
    %c0_1 = arith.constant 0 : index
    %0 = vector.load %arg2[%c0, %c0_0, %c0_1] : memref<1x32x128xbf16, #tpu.memory_space<vmem>>, vector<1x32x128xbf16>
    %1 = vector.shape_cast %0 : vector<1x32x128xbf16> to vector<32x128xbf16>
    %c0_2 = arith.constant 0 : index
    %c0_3 = arith.constant 0 : index
    %2 = vector.load %arg3[%c0_2, %c0_3] : memref<3x32xbf16, #tpu.memory_space<vmem>>, vector<3x32xbf16>
    %cst = arith.constant dense<0.000000e+00> : vector<3x128xf32>
    %3 = tpu.matmul %2, %1, %cst {dimension_numbers = #tpu.dot_dimension_numbers<[1], [0], [0], [1], [0, 0, 1, 1], [], []>} : vector<3x32xbf16>, vector<32x128xbf16>, vector<3x128xf32> -> vector<3x128xf32>
    %c0_4 = arith.constant 0 : index
    %c0_5 = arith.constant 0 : index
    %c0_6 = arith.constant 0 : index
    %4 = vector.load %arg4[%c0_4, %c0_5, %c0_6] : memref<1x3x128xf32, #tpu.memory_space<vmem>>, vector<1x3x128xf32>
    %5 = vector.shape_cast %4 : vector<1x3x128xf32> to vector<3x128xf32>
    %6 = vector.shape_cast %3 : vector<3x128xf32> to vector<1x3x128xf32>
    tpu.vector_store %arg4[%c0_4, %c0_5, %c0_6], %6 {strides = array<i32>} : memref<1x3x128xf32, #tpu.memory_space<vmem>>, vector<1x3x128xf32>,
    return
  }
  func.func @transform_0(%arg0: i32, %arg1: i32) -> (i32, i32, i32) {
    %c0_i32 = arith.constant 0 : i32
    %c0_i32_0 = arith.constant 0 : i32
    return %arg0, %c0_i32, %arg1 : i32, i32, i32
  }
  func.func @transform_1(%arg0: i32, %arg1: i32) -> (i32, i32) {
    %c0_i32 = arith.constant 0 : i32
    %c0_i32_0 = arith.constant 0 : i32
    %c0_i32_1 = arith.constant 0 : i32
    return %c0_i32, %c0_i32_0 : i32, i32
  }
  func.func @transform_2(%arg0: i32, %arg1: i32) -> (i32, i32, i32) {
    %c0_i32 = arith.constant 0 : i32
    %c0_i32_0 = arith.constant 0 : i32
    return %arg0, %c0_i32, %arg1 : i32, i32, i32
  }
}

</mosaic_0001>

<bundles_post_ra>
// kernel: bidirection_attention.5
= control target key start
LH: loop header
LB: loop body
LE: loop exit
PB: predicated region body
PF: predicated region fallthrough
CT: control target
= control target key end

     0   :  { %s588_s9 = smov 0   ;;  %s590_s10 = smov 0   ;;  %s671_s0 = inlined_call_operand.vmem [shape: bf16[2,4,512], index: 0, kind: input, shape index: {}]   ;;  %s672_s1 = inlined_call_operand.vmem [shape: bf16[64,4], index: 1, kind: input, shape index: {}]   ;;  %s673_s2 = inlined_call_operand.vmem [shape: bf16[2,64,512], index: 2, kind: output, shape index: {}]  }
   0x1   :  { %s592_s11 = smov 0  }
   0x2 LB: > { %s24_s12 = sadd.s32 1, %s567_s10  ;;  %p480_p0 = scmp.ge.s32.totalorder %s571_s11, 1  ;;  %s571_s11 = sphi %s592_s11, %s12_s11   ;;  %s567_s10 = sphi %s590_s10, %s675_s10   ;;  %s563_s9 = sphi %s588_s9, %s674_s9  }
   0x3   : > { %p26_p1 = scmp.ge.s32.totalorder %s24_s12, 2  ;;  %p133_p2 = scmp.lt.s32.totalorder %s571_s11, 3 }
   0x5   : > { %s677_s12 = smov (%p26_p1, %s24_s12), 0  ;;  %p134_p3 = pnand %p480_p0, %p133_p2 }
   0x6   : > { %p164_p4 = scmp.lt.s32.totalorder (!%p134_p3), %s563_s9, 1 }
   0x7   : > { %137 = sbr.rel (%p134_p3) target bundleno = 221 (0xdd), region = 28 }
   0xc   : > { %s679_s9 = smov (!%p164_p4, %s563_s9), 1  ;;  %vm232_vm0 = vcmask 1041408   ;;  %v521_v6 = vld [vmem:[%s672_s1] sm:$0xff]  ;;  %vm219_vm1 = vcmask 31744   ;;  %v522_v10 = vld [vmem:[%s672_s1 + $0x8] sm:$0xff]  ;;  %v523_v11 = vld [vmem:[%s672_s1 + $0x10] sm:$0xff] }
   0xd   : > { %s519_s13 = sshll.u32 %s679_s9, 3  ;;  %v524_v12 = vld [vmem:[%s672_s1 + $0x18] sm:$0xff]  ;;  %s520_s25 = sshll.u32 %s679_s9, 7 }
   0xe   : > { %s171_s16 = scalar_lea.vmem %s671_s0, %s519_s13  ;;  %s644_s28 = scalar_lea.vmem %s673_s2, %s520_s25 }
   0xf   : > { %v184_v0 = vld [vmem:[%s171_s16] sm:$0xff] }
  0x10   : > { %214 = vst [vmem:[#allocation1] ss:$4 sm:$0xff] %v184_v0 }
  0x17   : > { %v215_v1 = vld.sshfl [vmem:[#allocation1] sm:$0xff pattern:$0x73625140]  ;;  %v216_v2 = vld.sshfl [vmem:[#allocation1 + $0x8] sm:$0xff pattern:$0x73625140] }
  0x18   : > { %v233_v3 = vsel %vm232_vm0, %v215_v1, 0  ;;  %v235_v4 = vsel %vm232_vm0, %v216_v2, 0  ;;  %v217_v5 = vld.sshfl [vmem:[#allocation1 + $0x10] sm:$0xff pattern:$0x73625140] }
  0x19   : > { %248 = vmatpush.bf16.msra.mxu0 %v233_v3  ;;  %277 = vmatpush.bf16.msra.mxu1 %v235_v4  ;;  %v237_v7 = vsel %vm232_vm0, %v217_v5, 0  ;;  %v218_v8 = vld.sshfl [vmem:[#allocation1 + $0x18] sm:$0xff pattern:$0x73625140] }
  0x1a   : > { %306 = vmatpush.bf16.msra.mxu2 %v237_v7  ;;  %v239_v9 = vsel %vm232_vm0, %v218_v8, 0 }
  0x1b   : > { %335 = vmatpush.bf16.msra.mxu3 %v239_v9 }
  0x1c   : > { %501 = vmatmul.msk.bf16.vlgmr.msra.gmra.mxu0 %vm219_vm1, %v521_v6  ;;  %505 = vmatmul.msk.bf16.vlgmr.msra.gmra.mxu1 %vm219_vm1, %v521_v6 }
  0x1d   : > { %509 = vmatmul.msk.bf16.vlgmr.msra.gmra.mxu2 %vm219_vm1, %v521_v6 }
  0x1e   : > { %513 = vmatmul.msk.bf16.vlgmr.msra.gmra.mxu3 %vm219_vm1, %v521_v6 }
  0x2c   : > { %502 = vmatmul.msk.bf16.gmra.mxu0 %vm219_vm1, %v522_v10  ;;  %506 = vmatmul.msk.bf16.gmra.mxu1 %vm219_vm1, %v522_v10 }
  0x2d   : > { %510 = vmatmul.msk.bf16.gmra.mxu2 %vm219_vm1, %v522_v10 }
  0x2e   : > { %514 = vmatmul.msk.bf16.gmra.mxu3 %vm219_vm1, %v522_v10 }
  0x3c   : > { %503 = vmatmul.msk.bf16.gmra.mxu0 %vm219_vm1, %v523_v11  ;;  %507 = vmatmul.msk.bf16.gmra.mxu1 %vm219_vm1, %v523_v11 }
  0x3d   : > { %511 = vmatmul.msk.bf16.gmra.mxu2 %vm219_vm1, %v523_v11 }
  0x3e   : > { %515 = vmatmul.msk.bf16.gmra.mxu3 %vm219_vm1, %v523_v11 }
  0x4c   : > { %504 = vmatmul.msk.bf16.gmra.mxu0 %vm219_vm1, %v524_v12  ;;  %508 = vmatmul.msk.bf16.gmra.mxu1 %vm219_vm1, %v524_v12 }
  0x4d   : > { %512 = vmatmul.msk.bf16.gmra.mxu2 %vm219_vm1, %v524_v12 }
  0x4e   : > { %516 = vmatmul.msk.bf16.gmra.mxu3 %vm219_vm1, %v524_v12 }
  0x99   : > { %v250_v13 = vpop.f32.mrf.mxu0  ;;  %v279_v14 = vpop.f32.mrf.mxu1 }
  0x9a   : > { %v357_v15 = vpack.c.bf16 %v279_v14, %v250_v13 }
  0x9c   : > { %373 = vst [vmem:[%s644_s28] sm:$0xff] %v357_v15 }
  0xa0   : > { %v308_v16 = vpop.f32.mrf.mxu2 }
  0xa1   : > { %v337_v17 = vpop.f32.mrf.mxu3  ;;  %v252_v18 = vpop.f32.mrf.mxu0 }
  0xa2   : > { %v358_v19 = vpack.c.bf16 %v337_v17, %v308_v16  ;;  %v281_v20 = vpop.f32.mrf.mxu1 }
  0xa3   : > { %v359_v21 = vpack.c.bf16 %v281_v20, %v252_v18 }
  0xa4   : > { %374 = vst [vmem:[%s644_s28 + $0x8] sm:$0xff] %v358_v19 }
  0xa5   : > { %375 = vst [vmem:[%s644_s28 + $0x10] sm:$0xff] %v359_v21 }
  0xa8   : > { %v310_v22 = vpop.f32.mrf.mxu2 }
  0xa9   : > { %v339_v23 = vpop.f32.mrf.mxu3  ;;  %v255_v24 = vpop.f32.mrf.mxu0 }
  0xaa   : > { %v360_v25 = vpack.c.bf16 %v339_v23, %v310_v22  ;;  %v284_v26 = vpop.f32.mrf.mxu1 }
  0xab   : > { %v361_v27 = vpack.c.bf16 %v284_v26, %v255_v24 }
  0xac   : > { %376 = vst [vmem:[%s644_s28 + $0x18] sm:$0xff] %v360_v25 }
  0xad   : > { %377 = vst [vmem:[%s644_s28 + $0x20] sm:$0xff] %v361_v27 }
  0xb0   : > { %v313_v28 = vpop.f32.mrf.mxu2 }
  0xb1   : > { %v342_v29 = vpop.f32.mrf.mxu3  ;;  %v257_v30 = vpop.f32.mrf.mxu0 }
  0xb2   : > { %v362_v31 = vpack.c.bf16 %v342_v29, %v313_v28  ;;  %v286_v32 = vpop.f32.mrf.mxu1 }
  0xb3   : > { %v363_v33 = vpack.c.bf16 %v286_v32, %v257_v30 }
  0xb4   : > { %378 = vst [vmem:[%s644_s28 + $0x28] sm:$0xff] %v362_v31 }
  0xb5   : > { %379 = vst [vmem:[%s644_s28 + $0x30] sm:$0xff] %v363_v33 }
  0xb8   : > { %v315_v34 = vpop.f32.mrf.mxu2 }
  0xb9   : > { %v344_v35 = vpop.f32.mrf.mxu3  ;;  %v260_v36 = vpop.f32.mrf.mxu0 }
  0xba   : > { %v364_v37 = vpack.c.bf16 %v344_v35, %v315_v34  ;;  %v289_v38 = vpop.f32.mrf.mxu1 }
  0xbb   : > { %v365_v39 = vpack.c.bf16 %v289_v38, %v260_v36 }
  0xbc   : > { %380 = vst [vmem:[%s644_s28 + $0x38] sm:$0xff] %v364_v37 }
  0xbd   : > { %381 = vst [vmem:[%s644_s28 + $0x40] sm:$0xff] %v365_v39 }
  0xc0   : > { %v318_v40 = vpop.f32.mrf.mxu2 }
  0xc1   : > { %v347_v41 = vpop.f32.mrf.mxu3  ;;  %v262_v42 = vpop.f32.mrf.mxu0 }
  0xc2   : > { %v366_v43 = vpack.c.bf16 %v347_v41, %v318_v40  ;;  %v291_v44 = vpop.f32.mrf.mxu1 }
  0xc3   : > { %v367_v45 = vpack.c.bf16 %v291_v44, %v262_v42 }
  0xc4   : > { %382 = vst [vmem:[%s644_s28 + $0x48] sm:$0xff] %v366_v43 }
  0xc5   : > { %383 = vst [vmem:[%s644_s28 + $0x50] sm:$0xff] %v367_v45 }
  0xc8   : > { %v320_v46 = vpop.f32.mrf.mxu2 }
  0xc9   : > { %v349_v47 = vpop.f32.mrf.mxu3  ;;  %v265_v48 = vpop.f32.mrf.mxu0 }
  0xca   : > { %v368_v49 = vpack.c.bf16 %v349_v47, %v320_v46  ;;  %v294_v50 = vpop.f32.mrf.mxu1 }
  0xcb   : > { %v369_v51 = vpack.c.bf16 %v294_v50, %v265_v48 }
  0xcc   : > { %384 = vst [vmem:[%s644_s28 + $0x58] sm:$0xff] %v368_v49 }
  0xcd   : > { %385 = vst [vmem:[%s644_s28 + $0x60] sm:$0xff] %v369_v51 }
  0xd0   : > { %v323_v52 = vpop.f32.mrf.mxu2 }
  0xd1   : > { %v352_v53 = vpop.f32.mrf.mxu3  ;;  %v267_v54 = vpop.f32.mrf.mxu0 }
  0xd2   : > { %v370_v55 = vpack.c.bf16 %v352_v53, %v323_v52  ;;  %v296_v56 = vpop.f32.mrf.mxu1 }
  0xd3   : > { %v371_v57 = vpack.c.bf16 %v296_v56, %v267_v54 }
  0xd4   : > { %386 = vst [vmem:[%s644_s28 + $0x68] sm:$0xff] %v370_v55 }
  0xd5   : > { %387 = vst [vmem:[%s644_s28 + $0x70] sm:$0xff] %v371_v57 }
  0xd8   : > { %v325_v58 = vpop.f32.mrf.mxu2 }
  0xd9   : > { %v354_v59 = vpop.f32.mrf.mxu3 }
  0xda   : > { %v372_v60 = vpack.c.bf16 %v354_v59, %v325_v58 }
  0xdc   : > { %388 = vst [vmem:[%s644_s28 + $0x78] sm:$0xff] %v372_v60 }
  0xdd PF: > { %s12_s11 = sadd.s32 1, %s571_s11   ;;  %s674_s9 = smov %s567_s10 }
  0xde   : > { %p9_p5 = scmp.ge.s32.totalorder %s12_s11, 4   ;;  %s675_s10 = smov %s677_s12 }
  0xe0   :  { %11 = sbr.rel (!%p9_p5) target bundleno = 2 (0x2), region = 58 }

// kernel: bidirection_attention.6
= control target key start
LH: loop header
LB: loop body
LE: loop exit
PB: predicated region body
PF: predicated region fallthrough
CT: control target
= control target key end

     0   :  { %s473_s9 = smov 0   ;;  %s475_s10 = smov 0   ;;  %s518_s0 = inlined_call_operand.vmem [shape: bf16[2,3,128], index: 0, kind: input, shape index: {}]   ;;  %s519_s1 = inlined_call_operand.vmem [shape: bf16[64,3], index: 1, kind: input, shape index: {}]   ;;  %s520_s2 = inlined_call_operand.vmem [shape: bf16[2,64,128], index: 2, kind: output, shape index: {}]  }
   0x1   :  { %s477_s11 = smov 0  }
   0x2 LB: > { %s24_s12 = sadd.s32 1, %s451_s10  ;;  %p351_p0 = scmp.ge.s32.totalorder %s455_s11, 1  ;;  %s455_s11 = sphi %s477_s11, %s12_s11   ;;  %s451_s10 = sphi %s475_s10, %s522_s10   ;;  %s447_s9 = sphi %s473_s9, %s521_s9  }
   0x3   : > { %p26_p1 = scmp.ge.s32.totalorder %s24_s12, 2  ;;  %p130_p2 = scmp.lt.s32.totalorder %s455_s11, 3 }
   0x5   : > { %s524_s12 = smov (%p26_p1, %s24_s12), 0  ;;  %p131_p3 = pnand %p351_p0, %p130_p2 }
   0x6   : > { %p157_p4 = scmp.lt.s32.totalorder (!%p131_p3), %s447_s9, 1 }
   0x7   : > { %134 = sbr.rel (%p131_p3) target bundleno = 166 (0xa6), region = 28 }
   0xc   : > { %vm215_vm0 = vcmask 1040384   ;;  %vm216_vm1 = vcmask 1041408   ;;  %v457_v0 = vmov 65535   ;;  %s526_s9 = smov (!%p157_p4, %s447_s9), 1  ;;  %v378_v5 = vld [vmem:[%s519_s1] sm:$0xff]  ;;  %v379_v6 = vld [vmem:[%s519_s1 + $0x8] sm:$0xff] }
   0xd   : > { %v217_v1 = vsel %vm215_vm0, 4294967295, %v457_v0  ;;  %s352_s13 = sshll.u32 %s526_s9, 1  ;;  %vm202_vm2 = vcmask 23552   ;;  %v380_v7 = vld [vmem:[%s519_s1 + $0x10] sm:$0xff]  ;;  %v381_v8 = vld [vmem:[%s519_s1 + $0x18] sm:$0xff]  ;;  %s377_s25 = sshll.u32 %s526_s9, 5 }
   0xe   : > { %v218_v2 = vsel %vm216_vm1, %v217_v1, 0  ;;  %s163_s16 = scalar_lea.vmem %s518_s0, %s352_s13  ;;  %s171_s28 = scalar_lea.vmem %s520_s2, %s377_s25 }
   0xf   : > { %v173_v3 = vld [vmem:[%s163_s16] sm:$0x3] }
  0x10   : > { %v220_v4 = vand.u32 %v218_v2, %v173_v3 }
  0x12   : > { %229 = vmatpush.bf16.msra.mxu0 %v220_v4  ;;  %405 = vmatpush.bf16.msra.mxu1 %v220_v4 }
  0x13   : > { %406 = vmatpush.bf16.msra.mxu2 %v220_v4  ;;  %407 = vmatpush.bf16.msra.mxu3 %v220_v4 }
  0x15   : > { %371 = vmatmul.msk.bf16.vlgmr.msra.gmra.mxu0 %vm202_vm2, %v378_v5  ;;  %372 = vmatmul.msk.bf16.vlgmr.msra.gmra.mxu1 %vm202_vm2, %v379_v6 }
  0x16   : > { %373 = vmatmul.msk.bf16.vlgmr.msra.gmra.mxu2 %vm202_vm2, %v380_v7  ;;  %374 = vmatmul.msk.bf16.vlgmr.msra.gmra.mxu3 %vm202_vm2, %v381_v8 }
  0x92   : > { %v231_v9 = vpop.f32.mrf.mxu0  ;;  %v236_v10 = vpop.f32.mrf.mxu1 }
  0x99   : > { %v241_v11 = vpop.f32.mrf.mxu2  ;;  %v246_v12 = vpop.f32.mrf.mxu3 }
  0x9a   : > { %v233_v13 = vpop.f32.mrf.mxu0  ;;  %v238_v14 = vpop.f32.mrf.mxu1 }
  0x9b   : > { %v385_v15 = vpack.c.bf16 %v233_v13, %v231_v9  ;;  %v390_v16 = vpack.c.bf16 %v238_v14, %v236_v10 }
  0x9d   : > { %386 = vst [vmem:[%s171_s28] sm:$0xff] %v385_v15  }
  0x9e   : > { %402 = vst [vmem:[%s171_s28 + $0x8] sm:$0xff] %v390_v16  }
  0xa1   : > { %v243_v17 = vpop.f32.mrf.mxu2  ;;  %v248_v18 = vpop.f32.mrf.mxu3 }
  0xa2   : > { %v395_v19 = vpack.c.bf16 %v243_v17, %v241_v11  ;;  %v400_v20 = vpack.c.bf16 %v248_v18, %v246_v12 }
  0xa4   : > { %403 = vst [vmem:[%s171_s28 + $0x10] sm:$0xff] %v395_v19  }
  0xa5   : > { %404 = vst [vmem:[%s171_s28 + $0x18] sm:$0xff] %v400_v20  }
  0xa6 PF: > { %s12_s11 = sadd.s32 1, %s455_s11   ;;  %s521_s9 = smov %s451_s10 }
  0xa7   : > { %p9_p5 = scmp.ge.s32.totalorder %s12_s11, 4   ;;  %s522_s10 = smov %s524_s12 }
  0xa9   :  { %11 = sbr.rel (!%p9_p5) target bundleno = 2 (0x2), region = 58 }

// kernel: bidirection_attention.7
= control target key start
LH: loop header
LB: loop body
LE: loop exit
PB: predicated region body
PF: predicated region fallthrough
CT: control target
= control target key end

     0   :  { %s2197_s12 = smov 0   ;;  %s2199_s13 = smov 0   ;;  %s3121_s0 = inlined_call_operand.vmem [shape: bf16[2,2,2,16,512], index: 0, kind: input, shape index: {}]   ;;  %s3122_s1 = inlined_call_operand.vmem [shape: bf16[2,2,2,16,64], index: 1, kind: input, shape index: {}]   ;;  %s3123_s2 = inlined_call_operand.vmem [shape: bf16[2,2,16,512], index: 2, kind: output, shape index: {0}]   ;;  %s3124_s3 = inlined_call_operand.vmem [shape: bf16[2,2,16,64], index: 3, kind: output, shape index: {1}]  }
   0x1   :  { %s2201_s14 = smov 0   ;;  %s2203_s15 = smov 0  }
   0x2   :  { %s2205_s16 = smov 0   ;;  %s2207_s17 = smov 0  }
   0x3   :  { %s2209_s18 = smov 0  }
   0x4 LB: > { %s29_s19 = sadd.s32 1, %s2163_s16  ;;  %s33_s20 = sadd.s32 1, %s2167_s17  ;;  %s2171_s18 = sphi %s2209_s18, %s14_s18   ;;  %s2167_s17 = sphi %s2207_s17, %s3221_s17   ;;  %s2163_s16 = sphi %s2205_s16, %s3220_s16   ;;  %s2159_s15 = sphi %s2203_s15, %s3219_s15   ;;  %s2155_s14 = sphi %s2201_s14, %s3218_s14   ;;  %s2151_s13 = sphi %s2199_s13, %s3217_s13   ;;  %s2147_s12 = sphi %s2197_s12, %s3216_s12  }
   0x5   : > { %p31_p0 = scmp.ge.s32.totalorder %s29_s19, 2  ;;  %p51_p1 = scmp.ne.s32.totalorder %s2151_s13, %s2147_s12 }
   0x6   : > { %p52_p2 = scmp.eq.s32.totalorder %s2171_s18, 0  ;;  %s44_s25 = sadd.s32 1, %s2151_s13 }
   0x7   : > { %s3223_s19 = smov (%p31_p0, %s29_s19), 0  ;;  %s3225_s20 = smov (!%p31_p0, %s33_s20), %s2167_s17 }
   0x8   : > { %p2240_p3 = por %p52_p2, %p51_p1  ;;  %p35_p4 = scmp.ge.s32.totalorder %s3225_s20, 2 }
   0x9   : > { %s38_s22 = ssub.s32 %s2163_s16, %s3223_s19  ;;  %p1794_p6 = scmp.ge.s32.totalorder %s2171_s18, 4 }
   0xa   : > { %s3227_s20 = smov (%p35_p4, %s3225_s20), 0 }
   0xb   : > { %s37_s23 = ssub.s32 %s2167_s17, %s3227_s20  ;;  %163 = sbr.rel (%p1794_p6) target bundleno = 40 (0x28), region = 16 }
   0xc   : > { %s39_s24 = sor.u32 %s38_s22, %s37_s23 }
   0xd   : > { %p42_p5 = scmp.eq.s32.totalorder %s39_s24, 0 }
   0xf   : > { %s2252_s26 = scalar_select %p42_p5, %s2151_s13, %s44_s25  }
  0x10   : > { %166 = sbr.rel (!%p2240_p3) target bundleno = 31 (0x1f), region = 20  ;;  %s168_s27 = sand.u32 (%p2240_p3), 1, %s2151_s13  }
  0x11   : > { %s1796_s28 = sshll.u32 (%p2240_p3), %s2163_s16, 3  ;;  %s1795_s29 = sshll.u32 (%p2240_p3), %s168_s27, 6 }
  0x12   : > { %s1797_s30 = sshll.u32 (%p2240_p3), %s2167_s17, 5  ;;  %s170_s9 = scalar_lea.vmem (%p2240_p3), [#allocation5], %s1795_s29 }
  0x13   : > { %s175_s4 = sadd.s32 (%p2240_p3), %s1797_s30, %s1796_s28 }
  0x14   : > { %s1798_s5 = sshll.u32 (%p2240_p3), %s175_s4, 2 }
  0x15   : > { %s177_s8 = scalar_lea.vmem %s3121_s0, %s1798_s5 }
  0x16   : > { %v190_v0 = vld [vmem:[%s177_s8] sm:$0xff]  ;;  %v192_v1 = vld [vmem:[%s177_s8 + $0x8] sm:$0xff]  ;;  %v194_v2 = vld [vmem:[%s177_s8 + $0x10] sm:$0xff] }
  0x17   : > { %191 = vst [vmem:[%s170_s9] sm:$0xff] %v190_v0  ;;  %v196_v3 = vld [vmem:[%s177_s8 + $0x18] sm:$0xff]  ;;  %v198_v4 = vld [vmem:[%s177_s8 + $0x40] sm:$0xff]  ;;  %v200_v5 = vld [vmem:[%s177_s8 + $0x48] sm:$0xff] }
  0x18   : > { %193 = vst [vmem:[%s170_s9 + $0x8] sm:$0xff] %v192_v1  ;;  %v202_v6 = vld [vmem:[%s177_s8 + $0x50] sm:$0xff]  ;;  %v204_v7 = vld [vmem:[%s177_s8 + $0x58] sm:$0xff] }
  0x19   : > { %195 = vst [vmem:[%s170_s9 + $0x10] sm:$0xff] %v194_v2 }
  0x1a   : > { %197 = vst [vmem:[%s170_s9 + $0x18] sm:$0xff] %v196_v3 }
  0x1b   : > { %199 = vst [vmem:[%s170_s9 + $0x20] sm:$0xff] %v198_v4 }
  0x1c   : > { %201 = vst [vmem:[%s170_s9 + $0x28] sm:$0xff] %v200_v5 }
  0x1d   : > { %203 = vst [vmem:[%s170_s9 + $0x30] sm:$0xff] %v202_v6 }
  0x1e   : > { %205 = vst [vmem:[%s170_s9 + $0x38] sm:$0xff] %v204_v7 }
  0x1f PF: > { %211 = sbr.rel (!%p2240_p3) target bundleno = 40 (0x28), region = 43  ;;  %s213_s10 = sand.u32 (%p2240_p3), 1, %s2151_s13  }
  0x20   : > { %s1800_s11 = sshll.u32 (%p2240_p3), %s2163_s16, 1  ;;  %s1799_s22 = sshll.u32 (%p2240_p3), %s213_s10, 4 }
  0x21   : > { %s1801_s23 = sshll.u32 (%p2240_p3), %s2167_s17, 3  ;;  %s215_s30 = scalar_lea.vmem (%p2240_p3), [#allocation6], %s1799_s22 }
  0x22   : > { %s218_s24 = sadd.s32 (%p2240_p3), %s1801_s23, %s1800_s11 }
  0x23   : > { %s1802_s25 = sshll.u32 (%p2240_p3), %s218_s24, 2 }
  0x24   : > { %s220_s29 = scalar_lea.vmem %s3122_s1, %s1802_s25 }
  0x25   : > { %v237_v8 = vld [vmem:[%s220_s29] sm:$0xff]   ;;  %v241_v9 = vld [vmem:[%s220_s29 + $0x10] sm:$0xff]  }
  0x26   : > { %238 = vst [vmem:[%s215_s30] sm:$0xff] %v237_v8  }
  0x27   : > { %242 = vst [vmem:[%s215_s30 + $0x8] sm:$0xff] %v241_v9  }
  0x28 PF: > { %p1803_p7 = scmp.ge.s32.totalorder %s2171_s18, 1  ;;  %p275_p8 = scmp.lt.s32.totalorder %s2171_s18, 5 }
  0x2a   : > { %p276_p9 = pnand %p1803_p7, %p275_p8 }
  0x2c   : > { %279 = sbr.rel (%p276_p9) target bundleno = 1407 (0x57f), region = 84 }
  0x31   : > { %s282_s21 = sand.u32 1, %s2147_s12   ;;  %vm458_vm0 = vcmask 130048   ;;  %vm367_vm1 = vcmask 523264   ;;  %vm363_vm2 = vcmask 0   ;;  %vm365_vm3 = vcmask 516096   ;;  %p335_p10 = scmp.lt.s32.totalorder %s2159_s15, 1 }
  0x32   : > { %s1804_s4 = sshll.u32 %s282_s21, 6  ;;  %s2280_s6 = sshll.u32 %s282_s21, 4  ;;  %vm1600_vm4 = vcmask 519168  }
  0x33   : > { %s2274_s5 = scalar_lea.vmem [#allocation5], %s1804_s4  ;;  %s291_s12 = scalar_lea.vmem [#allocation6], %s2280_s6 }
  0x34   : > { %v1900_v10 = vld [vmem:[%s2274_s5 + $0x4] sm:$0xf]  ;;  %v1820_v11 = vld [vmem:[%s2274_s5] sm:$0xf]  ;;  %v1822_v12 = vld [vmem:[%s2274_s5 + $0x10] sm:$0xf0] }
  0x35   : > { %v1902_v13 = vld [vmem:[%s2274_s5 + $0xc] sm:$0xf0]  ;;  %v1825_v14 = vor.u32 %v1900_v10, %v1822_v12  ;;  %v1901_v17 = vld [vmem:[%s2274_s5 + $0xc] sm:$0xf]  ;;  %v1828_v18 = vld [vmem:[%s2274_s5 + $0x8] sm:$0xf] }
  0x36   : > { %v1821_v15 = vor.u32 %v1902_v13, %v1820_v11  ;;  %v1908_v16 = vld [vmem:[%s291_s12] sm:$0xff]  ;;  %v1830_v19 = vld [vmem:[%s2274_s5 + $0x18] sm:$0xf0]  ;;  %v1903_v20 = vld [vmem:[%s2274_s5 + $0x14] sm:$0xf0]  ;;  %p337_p11 = scmp.lt.s32.totalorder %s2155_s14, 1 }
  0x37   : > { %562 = vmatpush.bf16.msra.mxu0 %v1908_v16  ;;  %1910 = vmatpush.bf16.msra.mxu1 %v1908_v16  ;;  %v1829_v21 = vor.u32 %v1903_v20, %v1828_v18  ;;  %v1833_v22 = vor.u32 %v1901_v17, %v1830_v19  ;;  %s3229_s15 = smov (!%p335_p10, %s2159_s15), 1 }
  0x38   : > { %404 = vxpose.binary.xlu0.c.b16.start.end [1/2] (short) %v1825_v14, %v1821_v15, 128  ;;  %s3231_s14 = smov (!%p337_p11, %s2155_s14), 1  ;;  %s1810_s8 = sshll.u32 %s3229_s15, 2 }
  0x39   : > { %1911 = vmatpush.bf16.msra.mxu2 %v1908_v16  ;;  %s1809_s9 = sshll.u32 %s3231_s14, 1  ;;  %s1806_s11 = sshll.u32 %s3231_s14, 3 }
  0x3a   : > { %s3032_s10 = sadd.s32 %s1810_s8, %s1809_s9  ;;  %s1807_s22 = sshll.u32 %s3229_s15, 4 }
  0x3b   : > { %s344_s23 = sadd.s32 %s1807_s22, %s1806_s11  ;;  %s1811_s14 = sshll.u32 %s3032_s10, 2 }
  0x3c   : > { %s1808_s24 = sshll.u32 %s344_s23, 2  ;;  %s356_s30 = scalar_lea.vmem %s3124_s3, %s1811_s14 }
  0x3d   : > { %s3087_s28 = scalar_lea.vmem %s3123_s2, %s1808_s24 }
  0xb8   : > { %428 = vxpose.binary.xlu0.c.b16.start.end [1/2] (short) %v1833_v22, %v1829_v21, 128 }
  0xe4   : > { %v412_v23 = vpop.trf.xlu0 }
  0xe5   : > { %1838 = vmatmul.msk.bf16.vlgmr.msra.gmra.mxu0 %vm458_vm0, %v412_v23 }
  0xec   : > { %v413_v24 = vpop.trf.xlu0 }
  0xf4   : > { %v414_v25 = vpop.trf.xlu0 }
  0xf5   : > { %1839 = vmatmul.msk.bf16.gmra.mxu0 %vm458_vm0, %v414_v25 }
  0xfc   : > { %v415_v26 = vpop.trf.xlu0 }
 0x104   : > { %v416_v27 = vpop.trf.xlu0 }
 0x105   : > { %1840 = vmatmul.msk.bf16.gmra.mxu0 %vm458_vm0, %v416_v27 }
 0x10c   : > { %v417_v28 = vpop.trf.xlu0 }
 0x114   : > { %v418_v29 = vpop.trf.xlu0 }
 0x115   : > { %1841 = vmatmul.msk.bf16.gmra.mxu0 %vm458_vm0, %v418_v29 }
 0x11c   : > { %v419_v30 = vpop.trf.xlu0 }
 0x124   : > { %v420_v31 = vpop.trf.xlu0 }
 0x125   : > { %1842 = vmatmul.msk.bf16.gmra.mxu0 %vm458_vm0, %v420_v31 }
 0x12c   : > { %v421_v32 = vpop.trf.xlu0 }
 0x134   : > { %v422_v33 = vpop.trf.xlu0 }
 0x135   : > { %1843 = vmatmul.msk.bf16.gmra.mxu0 %vm458_vm0, %v422_v33 }
 0x13c   : > { %v423_v34 = vpop.trf.xlu0 }
 0x144   : > { %v424_v35 = vpop.trf.xlu0 }
 0x145   : > { %1844 = vmatmul.msk.bf16.gmra.mxu0 %vm458_vm0, %v424_v35 }
 0x14c   : > { %v425_v36 = vpop.trf.xlu0 }
 0x154   : > { %v426_v37 = vpop.trf.xlu0 }
 0x155   : > { %1845 = vmatmul.msk.bf16.gmra.mxu0 %vm458_vm0, %v426_v37 }
 0x15c   : > { %v427_v38 = vpop.trf.xlu0 }
 0x162   : > { %v2297_v39 = vpop.f32.mrf.mxu0 }
 0x163   : > { %3157 = vst [vmem:[#allocation7_spill] sm:$0xff] %v2297_v39 }
 0x164   : > { %v436_v40 = vpop.trf.xlu0 }
 0x165   : > { %1846 = vmatmul.msk.bf16.gmra.mxu0 %vm458_vm0, %v413_v24 }
 0x16a   : > { %v2300_v41 = vpop.f32.mrf.mxu0 }
 0x16b   : > { %3158 = vst [vmem:[#allocation8_spill] sm:$0xff] %v2300_v41 }
 0x16c   : > { %v437_v42 = vpop.trf.xlu0 }
 0x172   : > { %v2302_v43 = vpop.f32.mrf.mxu0 }
 0x173   : > { %3159 = vst [vmem:[#allocation9_spill] sm:$0xff] %v2302_v43 }
 0x174   : > { %v438_v44 = vpop.trf.xlu0 }
 0x175   : > { %1847 = vmatmul.msk.bf16.gmra.mxu0 %vm458_vm0, %v415_v26 }
 0x17a   : > { %v2305_v45 = vpop.f32.mrf.mxu0 }
 0x17b   : > { %3160 = vst [vmem:[#allocation10_spill] sm:$0xff] %v2305_v45 }
 0x17c   : > { %v439_v46 = vpop.trf.xlu0 }
 0x182   : > { %v2307_v47 = vpop.f32.mrf.mxu0 }
 0x183   : > { %3161 = vst [vmem:[#allocation11_spill] sm:$0xff] %v2307_v47 }
 0x184   : > { %v440_v48 = vpop.trf.xlu0 }
 0x185   : > { %1848 = vmatmul.msk.bf16.gmra.mxu0 %vm458_vm0, %v417_v28 }
 0x18a   : > { %v2310_v49 = vpop.f32.mrf.mxu0 }
 0x18b   : > { %3162 = vst [vmem:[#allocation12_spill] sm:$0xff] %v2310_v49 }
 0x18c   : > { %v441_v50 = vpop.trf.xlu0 }
 0x18d   : > { %1864 = vmatmul.msk.bf16.vlgmr.msra.gmra.mxu2 %vm458_vm0, %v441_v50 }
 0x192   : > { %v2313_v51 = vpop.f32.mrf.mxu0 }
 0x194   : > { %v442_v52 = vpop.trf.xlu0 }
 0x195   : > { %1849 = vmatmul.msk.bf16.gmra.mxu0 %vm458_vm0, %v419_v30 }
 0x19a   : > { %v2316_v53 = vpop.f32.mrf.mxu0 }
 0x19b   : > { %3163 = vst [vmem:[#allocation13_spill] sm:$0xff] %v2316_v53 }
 0x19c   : > { %v443_v54 = vpop.trf.xlu0 }
 0x19d   : > { %1865 = vmatmul.msk.bf16.gmra.mxu2 %vm458_vm0, %v443_v54 }
 0x1a2   : > { %v2319_v55 = vpop.f32.mrf.mxu0 }
 0x1a4   : > { %v444_v56 = vpop.trf.xlu0 }
 0x1a5   : > { %1850 = vmatmul.msk.bf16.gmra.mxu0 %vm458_vm0, %v421_v32  ;;  %1858 = vmatmul.msk.bf16.vlgmr.msra.gmra.mxu1 %vm458_vm0, %v444_v56 }
 0x1aa   : > { %v2323_v57 = vpop.f32.mrf.mxu0 }
 0x1ac   : > { %v445_v58 = vpop.trf.xlu0 }
 0x1ad   : > { %1866 = vmatmul.msk.bf16.gmra.mxu2 %vm458_vm0, %v445_v58 }
 0x1b2   : > { %v2326_v59 = vpop.f32.mrf.mxu0 }
 0x1b4   : > { %v446_v60 = vpop.trf.xlu0 }
 0x1b5   : > { %1851 = vmatmul.msk.bf16.gmra.mxu0 %vm458_vm0, %v423_v34  ;;  %1859 = vmatmul.msk.bf16.gmra.mxu1 %vm458_vm0, %v446_v60 }
 0x1ba   : > { %v2330_v61 = vpop.f32.mrf.mxu0 }
 0x1bc   : > { %v447_v62 = vpop.trf.xlu0 }
 0x1bd   : > { %1867 = vmatmul.msk.bf16.gmra.mxu2 %vm458_vm0, %v447_v62 }
 0x1c2   : > { %v2333_v63 = vpop.f32.mrf.mxu0 }
 0x1c4   : > { %v448_v0 = vpop.trf.xlu0 }
 0x1c5   : > { %1852 = vmatmul.msk.bf16.gmra.mxu0 %vm458_vm0, %v425_v36  ;;  %1860 = vmatmul.msk.bf16.gmra.mxu1 %vm458_vm0, %v448_v0 }
 0x1ca   : > { %v2337_v1 = vpop.f32.mrf.mxu0 }
 0x1cc   : > { %v449_v2 = vpop.trf.xlu0 }
 0x1cd   : > { %1868 = vmatmul.msk.bf16.gmra.mxu2 %vm458_vm0, %v449_v2 }
 0x1d2   : > { %v2340_v3 = vpop.f32.mrf.mxu0 }
 0x1d4   : > { %v450_v4 = vpop.trf.xlu0 }
 0x1d5   : > { %1853 = vmatmul.msk.bf16.gmra.mxu0 %vm458_vm0, %v427_v38  ;;  %1861 = vmatmul.msk.bf16.gmra.mxu1 %vm458_vm0, %v450_v4 }
 0x1da   : > { %v2344_v5 = vpop.f32.mrf.mxu0 }
 0x1dc   : > { %v451_v8 = vpop.trf.xlu0 }
 0x1dd   : > { %1869 = vmatmul.msk.bf16.gmra.mxu2 %vm458_vm0, %v451_v8 }
 0x1e2   : > { %v2346_v6 = vpop.f32.mrf.mxu0 }
 0x1e3   : > { %3164 = vst [vmem:[#allocation14_spill] sm:$0xff] %v2346_v6 }
 0x1e5   : > { %1854 = vmatmul.msk.bf16.gmra.mxu0 %vm458_vm0, %v436_v40  ;;  %1862 = vmatmul.msk.bf16.gmra.mxu1 %vm458_vm0, %v437_v42 }
 0x1ea   : > { %v2350_v7 = vpop.f32.mrf.mxu0 }
 0x1f2   : > { %v2353_v9 = vpop.f32.mrf.mxu0 }
 0x1f5   : > { %1855 = vmatmul.msk.bf16.gmra.mxu0 %vm458_vm0, %v438_v44  ;;  %1863 = vmatmul.msk.bf16.gmra.mxu1 %vm458_vm0, %v439_v46 }
 0x1fa   : > { %v2357_v10 = vpop.f32.mrf.mxu0 }
 0x202   : > { %v2359_v11 = vpop.f32.mrf.mxu0 }
 0x205   : > { %1856 = vmatmul.msk.bf16.gmra.mxu0 %vm458_vm0, %v440_v48 }
 0x20a   : > { %v2362_v12 = vpop.f32.mrf.mxu0 }
 0x210   : > { %v2377_v19 = vpop.f32.mrf.mxu2 }
 0x211   : > { %3165 = vst [vmem:[#allocation15_spill] sm:$0xff] %v2377_v19  ;;  %v826_v36 = vsel %vm367_vm1, %v2377_v19, -inf }
 0x212   : > { %v2364_v13 = vpop.f32.mrf.mxu0 }
 0x215   : > { %1857 = vmatmul.msk.bf16.gmra.mxu0 %vm458_vm0, %v442_v52 }
 0x218   : > { %v2383_v22 = vpop.f32.mrf.mxu2 }
 0x219   : > { %3166 = vst [vmem:[#allocation16_spill] sm:$0xff] %v2383_v22  ;;  %v828_v46 = vsel %vm367_vm1, %v2383_v22, -inf  ;;  %v728_v22 = vsel %vm367_vm1, %v2302_v43, -inf }
 0x21a   : > { %v2367_v14 = vpop.f32.mrf.mxu0 }
 0x220   : > { %v2391_v26 = vpop.f32.mrf.mxu2 }
 0x221   : > { %3167 = vst [vmem:[#allocation17_spill] sm:$0xff] %v2391_v26  ;;  %v830_v60 = vsel %vm367_vm1, %v2391_v26, -inf  ;;  %v740_v26 = vsel %vm367_vm1, %v2323_v57, -inf }
 0x222   : > { %v2369_v15 = vpop.f32.mrf.mxu0  ;;  %v2371_v16 = vpop.f32.mrf.mxu1 }
 0x223   : > { %v802_v32 = vsel %vm367_vm1, %v2371_v16, -inf }
 0x228   : > { %v2397_v29 = vpop.f32.mrf.mxu2 }
 0x229   : > { %3168 = vst [vmem:[#allocation18_spill] sm:$0xff] %v2397_v29  ;;  %v832_v8 = vsel %vm367_vm1, %v2397_v29, -inf }
 0x22a   : > { %v2373_v17 = vpop.f32.mrf.mxu0  ;;  %v2375_v18 = vpop.f32.mrf.mxu1 }
 0x22b   : > { %v804_v33 = vsel %vm367_vm1, %v2375_v18, -inf }
 0x22c   : > { %v803_v34 = vmax.f32 %v804_v33, %v802_v32 }
 0x22e   : > { %v811_v38 = vmax.f32 %v803_v34, %v826_v36 }
 0x230   : > { %v2407_v35 = vpop.f32.mrf.mxu2 }
 0x231   : > { %3169 = vst [vmem:[#allocation19_spill] sm:$0xff] %v2407_v35 }
 0x232   : > { %v2379_v20 = vpop.f32.mrf.mxu0  ;;  %v2381_v21 = vpop.f32.mrf.mxu1 }
 0x233   : > { %v806_v37 = vsel %vm367_vm1, %v2381_v21, -inf }
 0x234   : > { %v819_v44 = vmax.f32 %v811_v38, %v806_v37  ;;  %v834_v38 = vsel %vm367_vm1, %v2407_v35, -inf }
 0x236   : > { %v805_v50 = vmax.f32 %v828_v46, %v819_v44 }
 0x238   : > { %v2421_v54 = vpop.f32.mrf.mxu2 }
 0x239   : > { %3170 = vst [vmem:[#allocation20_spill] sm:$0xff] %v2421_v54 }
 0x23a   : > { %v2385_v23 = vpop.f32.mrf.mxu0  ;;  %v2387_v24 = vpop.f32.mrf.mxu1 }
 0x23b   : > { %v808_v48 = vsel %vm367_vm1, %v2387_v24, -inf }
 0x23c   : > { %v813_v52 = vmax.f32 %v805_v50, %v808_v48 }
 0x23e   : > { %v821_v0 = vmax.f32 %v813_v52, %v830_v60  ;;  %v836_v60 = vsel %vm367_vm1, %v2421_v54, -inf  ;;  %v746_v54 = vsel %vm367_vm1, %v2333_v63, -inf }
 0x240   : > { %v2437_v34 = vpop.f32.mrf.mxu2 }
 0x241   : > { %3171 = vst [vmem:[#allocation21_spill] sm:$0xff] %v2437_v34 }
 0x242   : > { %v2389_v25 = vpop.f32.mrf.mxu0  ;;  %v2393_v27 = vpop.f32.mrf.mxu1 }
 0x243   : > { %v810_v62 = vsel %vm367_vm1, %v2393_v27, -inf }
 0x244   : > { %v807_v2 = vmax.f32 %v810_v62, %v821_v0 }
 0x246   : > { %v815_v33 = vmax.f32 %v807_v2, %v832_v8 }
 0x248   : > { %v2447_v52 = vpop.f32.mrf.mxu2 }
 0x249   : > { %3173 = vst [vmem:[#allocation23_spill] sm:$0xff] %v2447_v52 }
 0x24a   : > { %v2395_v28 = vpop.f32.mrf.mxu0  ;;  %v2399_v30 = vpop.f32.mrf.mxu1 }
 0x24b   : > { %v812_v32 = vsel %vm367_vm1, %v2399_v30, -inf }
 0x24c   : > { %v823_v36 = vmax.f32 %v815_v33, %v812_v32  ;;  %v730_v33 = vsel %vm367_vm1, %v2307_v47, -inf }
 0x24e   : > { %v831_v46 = vmax.f32 %v823_v36, %v834_v38  ;;  %v838_v36 = vsel %vm367_vm1, %v2437_v34, -inf  ;;  %v736_v34 = vsel %vm367_vm1, %v2316_v53, -inf }
 0x250   : > { %v2475_v29 = vpop.f32.mrf.mxu2 }
 0x251   : > { %3175 = vst [vmem:[#allocation25_spill] sm:$0xff] %v2475_v29 }
 0x252   : > { %v2401_v31 = vpop.f32.mrf.mxu0  ;;  %v2413_v40 = vpop.f32.mrf.mxu1 }
 0x253   : > { %v814_v44 = vsel %vm367_vm1, %v2413_v40, -inf }
 0x254   : > { %v839_v50 = vmax.f32 %v831_v46, %v814_v44  ;;  %v732_v44 = vsel %vm367_vm1, %v2310_v49, -inf  ;;  %v756_v49 = vsel %vm367_vm1, %v2350_v7, -inf }
 0x256   : > { %v847_v0 = vmax.f32 %v839_v50, %v836_v60  ;;  %v726_v50 = vsel %vm367_vm1, %v2297_v39, -inf  ;;  %v734_v60 = vsel %vm367_vm1, %v2313_v51, -inf }
 0x257   : > { %v735_v35 = vmax.f32 %v728_v22, %v734_v60  ;;  %v840_v22 = vsel %vm367_vm1, %v2447_v52, -inf  ;;  %v744_v52 = vsel %vm367_vm1, %v2330_v61, -inf }
 0x25a   : > { %v2415_v42 = vpop.f32.mrf.mxu0  ;;  %v2425_v58 = vpop.f32.mrf.mxu1 }
 0x25b   : > { %v816_v62 = vsel %vm367_vm1, %v2425_v58, -inf }
 0x25c   : > { %v809_v8 = vmax.f32 %v816_v62, %v847_v0  ;;  %v738_v62 = vsel %vm367_vm1, %v2319_v55, -inf  ;;  %v727_v0 = vsel %vm367_vm1, %v2300_v41, -inf }
 0x25e   : > { %v817_v46 = vmax.f32 %v809_v8, %v838_v36  ;;  %v729_v8 = vsel %vm367_vm1, %v2305_v45, -inf  ;;  %v733_v36 = vmax.f32 %v727_v0, %v732_v44  ;;  %v748_v44 = vsel %vm367_vm1, %v2337_v1, -inf }
 0x25f   : > { %v750_v0 = vsel %vm367_vm1, %v2340_v3, -inf  ;;  %v737_v45 = vmax.f32 %v729_v8, %v736_v34 }
 0x262   : > { %v2423_v56 = vpop.f32.mrf.mxu0  ;;  %v2439_v37 = vpop.f32.mrf.mxu1 }
 0x263   : > { %3172 = vst [vmem:[#allocation22_spill] sm:$0xff] %v2439_v37  ;;  %v818_v38 = vsel %vm367_vm1, %v2439_v37, -inf  ;;  %v731_v37 = vmax.f32 %v726_v50, %v730_v33  ;;  %v742_v33 = vsel %vm367_vm1, %v2326_v59, -inf  ;;  %v754_v50 = vsel %vm367_vm1, %v2346_v6, -inf }
 0x264   : > { %v825_v19 = vmax.f32 %v817_v46, %v818_v38  ;;  %v743_v43 = vmax.f32 %v735_v35, %v742_v33  ;;  %v762_v6 = vsel %vm367_vm1, %v2359_v11, -inf  ;;  %v770_v35 = vsel %vm367_vm1, %v2369_v15, -inf }
 0x265   : > { %v739_v41 = vmax.f32 %v731_v37, %v738_v62  ;;  %v741_v37 = vmax.f32 %v733_v36, %v740_v26  ;;  %v766_v36 = vsel %vm367_vm1, %v2364_v13, -inf  ;;  %v842_v33 = vsel %vm367_vm1, %v2475_v29, -inf }
 0x266   : > { %v833_v39 = vmax.f32 %v825_v19, %v840_v22  ;;  %v751_v26 = vmax.f32 %v743_v43, %v750_v0  ;;  %v764_v19 = vsel %vm367_vm1, %v2362_v12, -inf  ;;  %v778_v43 = vsel %vm367_vm1, %v2389_v25, -inf }
 0x267   : > { %v747_v62 = vmax.f32 %v739_v41, %v746_v54  ;;  %v749_v47 = vmax.f32 %v741_v37, %v748_v44  ;;  %v758_v41 = vsel %vm367_vm1, %v2353_v9, -inf  ;;  %v752_v54 = vsel %vm367_vm1, %v2344_v5, -inf }
 0x268   : > { %v774_v37 = vsel %vm367_vm1, %v2379_v20, -inf  ;;  %v786_v0 = vsel %vm367_vm1, %v2423_v56, -inf }
 0x269   : > { %v755_v53 = vmax.f32 %v747_v62, %v754_v50  ;;  %v757_v34 = vmax.f32 %v749_v47, %v756_v49  ;;  %v759_v50 = vmax.f32 %v751_v26, %v758_v41  ;;  %v2525_v49 = vpop.f32.mrf.mxu2  ;;  %v780_v62 = vsel %vm367_vm1, %v2395_v28, -inf }
 0x26a   : > { %v2431_v4 = vpop.f32.mrf.mxu0  ;;  %v2453_v2 = vpop.f32.mrf.mxu1 }
 0x26b   : > { %3174 = vst [vmem:[#allocation24_spill] sm:$0xff] %v2453_v2  ;;  %v820_v60 = vsel %vm367_vm1, %v2453_v2, -inf  ;;  %v763_v8 = vmax.f32 %v755_v53, %v762_v6  ;;  %v765_v22 = vmax.f32 %v757_v34, %v764_v19  ;;  %v745_v6 = vmax.f32 %v737_v45, %v744_v52 }
 0x26c   : > { %v841_v2 = vmax.f32 %v833_v39, %v820_v60  ;;  %v772_v39 = vsel %vm367_vm1, %v2373_v17, -inf  ;;  %v767_v29 = vmax.f32 %v759_v50, %v766_v36  ;;  %v788_v45 = vsel %vm367_vm1, %v2431_v4, -inf }
 0x26d   : > { %v771_v60 = vmax.f32 %v763_v8, %v770_v35  ;;  %v782_v35 = vsel %vm367_vm1, %v2401_v31, -inf  ;;  %v760_v34 = vsel %vm367_vm1, %v2357_v10, -inf }
 0x26e   : > { %v849_v47 = vmax.f32 %v841_v2, %v842_v33  ;;  %v753_v2 = vmax.f32 %v745_v6, %v752_v54  ;;  %v775_v8 = vmax.f32 %v767_v29, %v774_v37  ;;  %v844_v54 = vsel %vm367_vm1, %v2525_v49, -inf }
 0x26f   : > { %v779_v26 = vmax.f32 %v771_v60, %v778_v43  ;;  %v768_v29 = vsel %vm367_vm1, %v2367_v14, -inf }
 0x270   : > { %v783_v50 = vmax.f32 %v775_v8, %v782_v35  ;;  %v784_v8 = vsel %vm367_vm1, %v2415_v42, -inf }
 0x272   : > { %v2445_v48 = vpop.f32.mrf.mxu0  ;;  %v2487_v38 = vpop.f32.mrf.mxu1 }
 0x273   : > { %3176 = vst [vmem:[#allocation26_spill] sm:$0xff] %v2487_v38  ;;  %v822_v44 = vsel %vm367_vm1, %v2487_v38, -inf  ;;  %v773_v38 = vmax.f32 %v765_v22, %v772_v39  ;;  %v787_v39 = vmax.f32 %v779_v26, %v786_v0  ;;  %v790_v43 = vsel %vm367_vm1, %v2445_v48, -inf  ;;  %v2557_v26 = vpop.f32.mrf.mxu2 }
 0x274   : > { %v827_v41 = vmax.f32 %v822_v44, %v849_v47  ;;  %v791_v6 = vmax.f32 %v783_v50, %v790_v43 }
 0x275   : > { %v781_v36 = vmax.f32 %v773_v38, %v780_v62  ;;  %v761_v38 = vmax.f32 %v753_v2, %v760_v34 }
 0x276   : > { %v829_v60 = vmax.f32 %v844_v54, %v827_v41  ;;  %v846_v54 = vsel %vm367_vm1, %v2557_v26, -inf }
 0x277   : > { %v789_v22 = vmax.f32 %v781_v36, %v788_v45  ;;  %v769_v45 = vmax.f32 %v761_v38, %v768_v29 }
 0x27a   : > { %v2455_v32 = vpop.f32.mrf.mxu0  ;;  %v2535_v19 = vpop.f32.mrf.mxu1 }
 0x27b   : > { %3177 = vst [vmem:[#allocation27_spill] sm:$0xff] %v2535_v19  ;;  %v824_v33 = vsel %vm367_vm1, %v2535_v19, -inf  ;;  %v776_v19 = vsel %vm367_vm1, %v2385_v23, -inf  ;;  %v792_v36 = vsel %vm367_vm1, %v2455_v32, -inf }
 0x27c   : > { %v835_v37 = vmax.f32 %v824_v33, %v829_v60  ;;  %v777_v2 = vmax.f32 %v769_v45, %v776_v19 }
 0x282   : > { %v2489_v46 = vpop.f32.mrf.mxu0 }
 0x283   : > { %v794_v52 = vsel %vm367_vm1, %v2489_v46, -inf }
 0x284   : > { %v795_v47 = vmax.f32 %v787_v39, %v794_v52  ;;  %v785_v39 = vmax.f32 %v777_v2, %v784_v8  ;;  %v2174_v2 = vmov 0  }
 0x285   : > { %1974 = vset.pattern.permute.xlu1 %v2174_v2  ;;  %1975 = vset.pattern.permute.xlu2 %v2174_v2 }
 0x286   : > { %v837_v41 = vmax.f32 %v795_v47, %v835_v37  ;;  %v793_v33 = vmax.f32 %v785_v39, %v792_v36  ;;  %v2573_v47 = vpop.f32.mrf.mxu2  ;;  %1976 = vset.pattern.permute.xlu0 %v2174_v2 }
 0x287   : > { %v848_v29 = vsel %vm367_vm1, %v2573_v47, -inf }
 0x28a   : > { %v2527_v53 = vpop.f32.mrf.mxu0 }
 0x28b   : > { %v796_v44 = vsel %vm367_vm1, %v2527_v53, -inf }
 0x28c   : > { %v797_v62 = vmax.f32 %v789_v22, %v796_v44 }
 0x28e   : > { %v843_v34 = vmax.f32 %v797_v62, %v837_v41 }
 0x292   : > { %v2555_v0 = vpop.f32.mrf.mxu0 }
 0x293   : > { %v798_v35 = vsel %vm367_vm1, %v2555_v0, -inf }
 0x294   : > { %v799_v52 = vmax.f32 %v791_v6, %v798_v35  ;;  %v2173_v6 = vmov -inf  }
 0x295   : > { %364 = vst.msk [vmem:[#allocation2] sm:$0x1] %vm363_vm2, %v2173_v6 }
 0x296   : > { %v845_v43 = vmax.f32 %v799_v52, %v843_v34  ;;  %v2175_v34 = vmov 0.0  }
 0x297   : > { %366 = vst.msk [vmem:[#allocation3] sm:$0x1] %vm365_vm3, %v2175_v34 }
 0x298   : > { %v850_v22 = vmax.f32 %v846_v54, %v845_v43  ;;  %368 = vst.msk [vmem:[#allocation4] sm:$0xff] %vm367_vm1, %v2175_v34 }
 0x299   : > { %369 = vst.msk [vmem:[#allocation4 + $0x8] sm:$0xff] %vm367_vm1, %v2175_v34 }
 0x29a   : > { %v2569_v44 = vpop.f32.mrf.mxu0 }
 0x29b   : > { %v800_v50 = vsel %vm367_vm1, %v2569_v44, -inf }
 0x29c   : > { %v801_v60 = vmax.f32 %v793_v33, %v800_v50  ;;  %v724_v36 = vld [vmem:[#allocation2] sm:$0x1] }
 0x29e   : > { %v851_v19 = vmax.f32 %v801_v60, %v850_v22 }
 0x2a0   : > { %v852_v38 = vmax.f32 %v848_v29, %v851_v19 }
 0x2a2   : > { %853 = vmax.xlane.f32.xlu1 %v852_v38 }
 0x315   : > { %v854_v37 = vpop.xlane.xlu1 %853 }
 0x316   : > { %v855_v62 = vrot.slane %v854_v37, 4 }
 0x318   : > { %v856_v35 = vmax.f32 %v854_v37, %v855_v62 }
 0x31a   : > { %v857_v45 = vrot.slane %v856_v35, 2 }
 0x31c   : > { %v858_v41 = vmax.f32 %v856_v35, %v857_v45 }
 0x31e   : > { %v859_v52 = vrot.slane %v858_v41, 1 }
 0x320   : > { %v860_v8 = vmax.f32 %v858_v41, %v859_v52 }
 0x322   : > { %1912 = vpush %v860_v8 }
 0x353   : > { %s1913_s7 = spop %1912 }
 0x354   : > { %v862_v39 = vstv %s1913_s7 }
 0x355   : > { %v863_v43 = vmax.f32 %v724_v36, %v862_v39 }
 0x357   : > { %v864_v54 = vsub.f32 %v724_v36, %v863_v43  ;;  %1585 = vst.msk [vmem:[#allocation2] sm:$0x1] %vm363_vm2, %v863_v43  ;;  %v868_v33 = vperm.slane %v863_v43, 0 }
 0x359   : > { %v865_v50 = vmul.f32 1.442695, %v864_v54  ;;  %870 = vperm.xlu1 %1974, %v868_v33  }
 0x35b   : > { %1977 = vpow2.f32 %v865_v50 }
 0x361   : > { %v1978_v22 = vpop.eup %1977 }
 0x362   : > { %1563 = vperm.xlu2 %1975, %v1978_v22   ;;  %v1573_v60 = vperm.slane %v1978_v22, 0 }
 0x36a   : > { %1575 = vperm.xlu2 %1975, %v1573_v60  }
 0x3cb   : > { %v2582_v19 = vpop.permute.xlu1 %870 }
 0x3cc   : > { %v887_v29 = vsub.f32 %v2340_v3, %v2582_v19  ;;  %v888_v38 = vsub.f32 %v2344_v5, %v2582_v19  ;;  %v903_v6 = vsub.f32 %v2401_v31, %v2582_v19  ;;  %v904_v37 = vsub.f32 %v2415_v42, %v2582_v19 }
 0x3cd   : > { %v919_v62 = vsub.f32 %v2413_v40, %v2582_v19  ;;  %v920_v35 = vsub.f32 %v2425_v58, %v2582_v19  ;;  %v885_v45 = vsub.f32 %v2333_v63, %v2582_v19  ;;  %v886_v3 = vsub.f32 %v2337_v1, %v2582_v19 }
 0x3ce   : > { %v944_v41 = vpack.c.bf16 %v888_v38, %v887_v29  ;;  %v952_v5 = vpack.c.bf16 %v904_v37, %v903_v6  ;;  %v901_v31 = vsub.f32 %v2389_v25, %v2582_v19  ;;  %v902_v42 = vsub.f32 %v2395_v28, %v2582_v19 }
 0x3cf   : > { %v960_v52 = vpack.c.bf16 %v920_v35, %v919_v62  ;;  %v943_v8 = vpack.c.bf16 %v886_v3, %v885_v45  ;;  %v917_v40 = vsub.f32 %v2393_v27, %v2582_v19  ;;  %v918_v58 = vsub.f32 %v2399_v30, %v2582_v19 }
 0x3d0   : > { %v983_v63 = vunpack.c.l.bf16 %v944_v41  ;;  %v984_v2 = vunpack.c.h.bf16 %v944_v41  ;;  %v999_v34 = vunpack.c.l.bf16 %v952_v5  ;;  %v1000_v1 = vunpack.c.h.bf16 %v952_v5 }
 0x3d1   : > { %v1015_v36 = vunpack.c.l.bf16 %v960_v52  ;;  %v1016_v39 = vunpack.c.h.bf16 %v960_v52  ;;  %v981_v43 = vunpack.c.l.bf16 %v943_v8  ;;  %v982_v54 = vunpack.c.h.bf16 %v943_v8 }
 0x3d2   : > { %v1061_v25 = vmul.f32 1.442695, %v983_v63  ;;  %v1063_v33 = vmul.f32 1.442695, %v984_v2  ;;  %v1093_v50 = vmul.f32 1.442695, %v999_v34  ;;  %v951_v28 = vpack.c.bf16 %v902_v42, %v901_v31 }
 0x3d3   : > { %v1095_v22 = vmul.f32 1.442695, %v1000_v1  ;;  %v1125_v60 = vmul.f32 1.442695, %v1015_v36  ;;  %v1127_v29 = vmul.f32 1.442695, %v1016_v39  ;;  %v959_v38 = vpack.c.bf16 %v918_v58, %v917_v40 }
 0x3d4   : > { %1979 = vpow2.f32 %v1061_v25  ;;  %v1057_v27 = vmul.f32 1.442695, %v981_v43  ;;  %v1059_v6 = vmul.f32 1.442695, %v982_v54  ;;  %v997_v30 = vunpack.c.l.bf16 %v951_v28 }
 0x3d5   : > { %1981 = vpow2.f32 %v1063_v33  ;;  %v998_v37 = vunpack.c.h.bf16 %v951_v28  ;;  %v1013_v62 = vunpack.c.l.bf16 %v959_v38  ;;  %v1014_v35 = vunpack.c.h.bf16 %v959_v38 }
 0x3d6   : > { %1983 = vpow2.f32 %v1093_v50  ;;  %v1089_v45 = vmul.f32 1.442695, %v997_v30  ;;  %v883_v3 = vsub.f32 %v2326_v59, %v2582_v19  ;;  %v884_v41 = vsub.f32 %v2330_v61, %v2582_v19 }
 0x3d7   : > { %1985 = vpow2.f32 %v1095_v22  ;;  %v1091_v5 = vmul.f32 1.442695, %v998_v37  ;;  %v1121_v31 = vmul.f32 1.442695, %v1013_v62  ;;  %v1123_v42 = vmul.f32 1.442695, %v1014_v35 }
 0x3d8   : > { %1987 = vpow2.f32 %v1125_v60  ;;  %v942_v52 = vpack.c.bf16 %v884_v41, %v883_v3  ;;  %v899_v8 = vsub.f32 %v2379_v20, %v2582_v19  ;;  %v900_v40 = vsub.f32 %v2385_v23, %v2582_v19 }
 0x3d9   : > { %1989 = vpow2.f32 %v1127_v29  ;;  %v915_v58 = vsub.f32 %v2381_v21, %v2582_v19  ;;  %v916_v59 = vsub.f32 %v2387_v24, %v2582_v19  ;;  %v881_v61 = vsub.f32 %v2319_v55, %v2582_v19 }
 0x3da   : > { %v1980_v63 = vpop.eup %1979  ;;  %1991 = vpow2.f32 %v1057_v27  ;;  %v979_v2 = vunpack.c.l.bf16 %v942_v52  ;;  %v980_v34 = vunpack.c.h.bf16 %v942_v52  ;;  %v950_v1 = vpack.c.bf16 %v900_v40, %v899_v8 }
 0x3db   : > { %v1982_v36 = vpop.eup %1981  ;;  %1993 = vpow2.f32 %v1059_v6  ;;  %v958_v20 = vpack.c.bf16 %v916_v59, %v915_v58  ;;  %v882_v23 = vsub.f32 %v2323_v57, %v2582_v19  ;;  %v897_v21 = vsub.f32 %v2369_v15, %v2582_v19 }
 0x3dc   : > { %v1984_v39 = vpop.eup %1983  ;;  %v2626_v43 = vpack.c.bf16 %v1982_v36, %v1980_v63  ;;  %1995 = vpow2.f32 %v1089_v45  ;;  %v1053_v24 = vmul.f32 1.442695, %v979_v2  ;;  %v1055_v55 = vmul.f32 1.442695, %v980_v34 }
 0x3dd   : > { %v1986_v54 = vpop.eup %1985  ;;  %1997 = vpow2.f32 %v1091_v5  ;;  %v995_v25 = vunpack.c.l.bf16 %v950_v1  ;;  %v996_v33 = vunpack.c.h.bf16 %v950_v1  ;;  %v1011_v50 = vunpack.c.l.bf16 %v958_v20 }
 0x3de   : > { %v1988_v28 = vpop.eup %1987  ;;  %v2630_v22 = vsel %vm367_vm1, %v2626_v43, 0  ;;  %v2632_v57 = vpack.c.bf16 %v1986_v54, %v1984_v39  ;;  %1999 = vpow2.f32 %v1121_v31  ;;  %v1012_v15 = vunpack.c.h.bf16 %v958_v20 }
 0x3df   : > { %v1990_v60 = vpop.eup %1989  ;;  %1292 = vmatpush.bf16.xpose.msrb.mxu1 %v2630_v22  ;;  %2001 = vpow2.f32 %v1123_v42  ;;  %v1085_v29 = vmul.f32 1.442695, %v995_v25  ;;  %v1087_v38 = vmul.f32 1.442695, %v996_v33  ;;  %v1117_v27 = vmul.f32 1.442695, %v1011_v50 }
 0x3e0   : > { %v1992_v6 = vpop.eup %1991  ;;  %v2637_v30 = vsel %vm367_vm1, %v2632_v57, 0  ;;  %v2639_v37 = vpack.c.bf16 %v1990_v60, %v1988_v28  ;;  %2003 = vpow2.f32 %v1053_v24  ;;  %v1119_v62 = vmul.f32 1.442695, %v1012_v15 }
 0x3e1   : > { %v1994_v35 = vpop.eup %1993  ;;  %1305 = vmatpush.bf16.xpose.msrb.mxu2 %v2637_v30  ;;  %2005 = vpow2.f32 %v1055_v55  ;;  %v941_v45 = vpack.c.bf16 %v882_v23, %v881_v61  ;;  %v898_v3 = vsub.f32 %v2373_v17, %v2582_v19  ;;  %v913_v41 = vsub.f32 %v2371_v16, %v2582_v19 }
 0x3e2   : > { %v1996_v5 = vpop.eup %1995  ;;  %v2648_v31 = vsel %vm367_vm1, %v2639_v37, 0  ;;  %v2650_v42 = vpack.c.bf16 %v1994_v35, %v1992_v6  ;;  %2007 = vpow2.f32 %v1085_v29  ;;  %v914_v52 = vsub.f32 %v2375_v18, %v2582_v19 }
 0x3e3   : > { %v1998_v8 = vpop.eup %1997  ;;  %1318 = vmatpush.bf16.xpose.msra.mxu3 %v2648_v31  ;;  %2009 = vpow2.f32 %v1087_v38  ;;  %v977_v40 = vunpack.c.l.bf16 %v941_v45  ;;  %v978_v17 = vunpack.c.h.bf16 %v941_v45  ;;  %v949_v58 = vpack.c.bf16 %v898_v3, %v897_v21  ;;  %v3181_v38 = vld [vmem:[#allocation13_spill] sm:$0xff] }
 0x3e4   : > { %3178 = vst [vmem:[#allocation28_spill] sm:$0xff] %v2650_v42  ;;  %v2000_v59 = vpop.eup %1999  ;;  %v2655_v16 = vpack.c.bf16 %v1998_v8, %v1996_v5  ;;  %2011 = vpow2.f32 %v1117_v27  ;;  %v957_v61 = vpack.c.bf16 %v914_v52, %v913_v41  ;;  %v2659_v18 = vsel %vm367_vm1, %v2650_v42, 0 }
 0x3e5   : > { %v2002_v63 = vpop.eup %2001  ;;  %2013 = vpow2.f32 %v1119_v62  ;;  %v1049_v2 = vmul.f32 1.442695, %v977_v40  ;;  %v1051_v34 = vmul.f32 1.442695, %v978_v17  ;;  %v993_v1 = vunpack.c.l.bf16 %v949_v58 }
 0x3e6   : > { %3179 = vst [vmem:[#allocation29_spill] sm:$0xff] %v2655_v16  ;;  %v2004_v36 = vpop.eup %2003  ;;  %v2661_v20 = vpack.c.bf16 %v2002_v63, %v2000_v59  ;;  %v994_v23 = vunpack.c.h.bf16 %v949_v58  ;;  %v1009_v39 = vunpack.c.l.bf16 %v957_v61  ;;  %v1010_v55 = vunpack.c.h.bf16 %v957_v61  ;;  %v3183_v61 = vld [vmem:[#allocation11_spill] sm:$0xff] }
 0x3e7   : > { %v2006_v21 = vpop.eup %2005  ;;  %1293 = vmatpush.bf16.xpose.msrb.mxu1 %v2659_v18  ;;  %2015 = vpow2.f32 %v1049_v2  ;;  %v1081_v24 = vmul.f32 1.442695, %v993_v1  ;;  %v879_v54 = vsub.f32 %v2313_v51, %v2582_v19  ;;  %v2668_v33 = vsel %vm367_vm1, %v2655_v16, 0  ;;  %v3184_v1 = vld [vmem:[#allocation12_spill] sm:$0xff] }
 0x3e8   : > { %v2008_v25 = vpop.eup %2007  ;;  %v2670_v50 = vpack.c.bf16 %v2006_v21, %v2004_v36  ;;  %2017 = vpow2.f32 %v1051_v34  ;;  %v1083_v28 = vmul.f32 1.442695, %v994_v23  ;;  %v1113_v60 = vmul.f32 1.442695, %v1009_v39 }
 0x3e9   : > { %v2010_v15 = vpop.eup %2009  ;;  %1306 = vmatpush.bf16.xpose.msrb.mxu2 %v2668_v33  ;;  %2019 = vpow2.f32 %v1081_v24  ;;  %v1115_v29 = vmul.f32 1.442695, %v1010_v55  ;;  %v880_v27 = vsub.f32 %v3181_v38, %v2582_v19  ;;  %v2677_v51 = vsel %vm367_vm1, %v2661_v20, 0 }
 0x3ea   : > { %3180 = vst [vmem:[#allocation30_spill] sm:$0xff] %v2670_v50  ;;  %v2012_v6 = vpop.eup %2011  ;;  %v2679_v62 = vpack.c.bf16 %v2010_v15, %v2008_v25  ;;  %2021 = vpow2.f32 %v1083_v28  ;;  %v895_v35 = vsub.f32 %v2364_v13, %v2582_v19  ;;  %v896_v41 = vsub.f32 %v2367_v14, %v2582_v19 }
 0x3eb   : > { %v2014_v45 = vpop.eup %2013  ;;  %1319 = vmatpush.bf16.xpose.msra.mxu3 %v2677_v51  ;;  %2023 = vpow2.f32 %v1113_v60  ;;  %v940_v3 = vpack.c.bf16 %v880_v27, %v879_v54  ;;  %v911_v5 = vsub.f32 %v2555_v0, %v2582_v19  ;;  %v2690_v52 = vsel %vm367_vm1, %v2670_v50, 0 }
 0x3ec   : > { %3182 = vst [vmem:[#allocation13_spill] sm:$0xff] %v2679_v62  ;;  %v2692_v8 = vpack.c.bf16 %v2014_v45, %v2012_v6  ;;  %2025 = vpow2.f32 %v1115_v29  ;;  %v912_v13 = vsub.f32 %v2569_v44, %v2582_v19  ;;  %v948_v59 = vpack.c.bf16 %v896_v41, %v895_v35 }
 0x3ed   : > { %v2016_v40 = vpop.eup %2015  ;;  %v975_v17 = vunpack.c.l.bf16 %v940_v3  ;;  %v976_v58 = vunpack.c.h.bf16 %v940_v3  ;;  %v877_v14 = vsub.f32 %v3183_v61, %v2582_v19  ;;  %v2700_v0 = vsel %vm367_vm1, %v2679_v62, 0 }
 0x3ee   : > { %v2018_v63 = vpop.eup %2017  ;;  %v2704_v2 = vsel %vm367_vm1, %v2692_v8, 0  ;;  %v956_v34 = vpack.c.bf16 %v912_v13, %v911_v5  ;;  %v878_v44 = vsub.f32 %v3184_v1, %v2582_v19  ;;  %v991_v24 = vunpack.c.l.bf16 %v948_v59 }
 0x3ef   : > { %v2020_v36 = vpop.eup %2019  ;;  %1294 = vmatpush.bf16.xpose.msrb.mxu1 %v2690_v52  ;;  %v2709_v23 = vpack.c.bf16 %v2018_v63, %v2016_v40  ;;  %v1045_v39 = vmul.f32 1.442695, %v975_v17  ;;  %v1047_v21 = vmul.f32 1.442695, %v976_v58  ;;  %v992_v54 = vunpack.c.h.bf16 %v948_v59 }
 0x3f0   : > { %v2022_v55 = vpop.eup %2021  ;;  %v1007_v25 = vunpack.c.l.bf16 %v956_v34  ;;  %v1008_v28 = vunpack.c.h.bf16 %v956_v34  ;;  %v939_v15 = vpack.c.bf16 %v878_v44, %v877_v14  ;;  %v1077_v38 = vmul.f32 1.442695, %v991_v24  ;;  %v3185_v34 = vld [vmem:[#allocation9_spill] sm:$0xff] }
 0x3f1   : > { %v2024_v60 = vpop.eup %2023  ;;  %1307 = vmatpush.bf16.xpose.msrb.mxu2 %v2700_v0  ;;  %v2712_v29 = vpack.c.bf16 %v2022_v55, %v2020_v36  ;;  %2027 = vpow2.f32 %v1045_v39  ;;  %v893_v27 = vsub.f32 %v2359_v11, %v2582_v19  ;;  %v1079_v35 = vmul.f32 1.442695, %v992_v54 }
 0x3f2   : > { %v2026_v6 = vpop.eup %2025  ;;  %2029 = vpow2.f32 %v1047_v21  ;;  %v1109_v45 = vmul.f32 1.442695, %v1007_v25  ;;  %v1111_v3 = vmul.f32 1.442695, %v1008_v28  ;;  %v2719_v41 = vsel %vm367_vm1, %v2709_v23, 0 }
 0x3f3   : > { %1320 = vmatpush.bf16.xpose.msra.mxu3 %v2704_v2  ;;  %v2723_v5 = vsel %vm367_vm1, %v2712_v29, 0  ;;  %2031 = vpow2.f32 %v1077_v38  ;;  %v973_v13 = vunpack.c.l.bf16 %v939_v15  ;;  %v974_v40 = vunpack.c.h.bf16 %v939_v15 }
 0x3f4   : > { %2033 = vpow2.f32 %v1079_v35  ;;  %v894_v11 = vsub.f32 %v2362_v12, %v2582_v19  ;;  %v909_v17 = vsub.f32 %v2489_v46, %v2582_v19  ;;  %v2729_v58 = vpack.c.bf16 %v2026_v6, %v2024_v60  ;;  %v3186_v46 = vld [vmem:[#allocation10_spill] sm:$0xff] }
 0x3f5   : > { %2035 = vpow2.f32 %v1109_v45  ;;  %v1041_v59 = vmul.f32 1.442695, %v973_v13  ;;  %v910_v61 = vsub.f32 %v2527_v53, %v2582_v19  ;;  %v1043_v14 = vmul.f32 1.442695, %v974_v40 }
 0x3f6   : > { %2037 = vpow2.f32 %v1111_v3  ;;  %v947_v63 = vpack.c.bf16 %v894_v11, %v893_v27  ;;  %v875_v1 = vsub.f32 %v3185_v34, %v2582_v19  ;;  %v876_v36 = vsub.f32 %v3186_v46, %v2582_v19 }
 0x3f7   : > { %v2028_v44 = vpop.eup %2027  ;;  %1295 = vmatpush.bf16.xpose.msrb.mxu1 %v2719_v41  ;;  %2039 = vpow2.f32 %v1041_v59  ;;  %v955_v12 = vpack.c.bf16 %v910_v61, %v909_v17  ;;  %v891_v39 = vsub.f32 %v2353_v9, %v2582_v19  ;;  %v892_v55 = vsub.f32 %v2357_v10, %v2582_v19 }
 0x3f8   : > { %v2030_v21 = vpop.eup %2029  ;;  %2041 = vpow2.f32 %v1043_v14  ;;  %v989_v53 = vunpack.c.l.bf16 %v947_v63  ;;  %v990_v24 = vunpack.c.h.bf16 %v947_v63  ;;  %v938_v60 = vpack.c.bf16 %v876_v36, %v875_v1 }
 0x3f9   : > { %v2032_v54 = vpop.eup %2031  ;;  %1308 = vmatpush.bf16.xpose.msrb.mxu2 %v2723_v5  ;;  %v2743_v25 = vpack.c.bf16 %v2030_v21, %v2028_v44  ;;  %v1005_v28 = vunpack.c.l.bf16 %v955_v12  ;;  %v1006_v15 = vunpack.c.h.bf16 %v955_v12  ;;  %v2747_v27 = vsel %vm367_vm1, %v2729_v58, 0 }
 0x3fa   : > { %v2034_v38 = vpop.eup %2033  ;;  %v1073_v9 = vmul.f32 1.442695, %v989_v53  ;;  %v1075_v6 = vmul.f32 1.442695, %v990_v24  ;;  %v946_v35 = vpack.c.bf16 %v892_v55, %v891_v39  ;;  %v907_v40 = vsub.f32 %v2445_v48, %v2582_v19  ;;  %v3188_v24 = vld [vmem:[#allocation7_spill] sm:$0xff] }
 0x3fb   : > { %v2036_v45 = vpop.eup %2035  ;;  %1321 = vmatpush.bf16.xpose.msra.mxu3 %v2747_v27  ;;  %v2750_v10 = vpack.c.bf16 %v2034_v38, %v2032_v54  ;;  %v1105_v3 = vmul.f32 1.442695, %v1005_v28  ;;  %v1107_v13 = vmul.f32 1.442695, %v1006_v15  ;;  %v971_v17 = vunpack.c.l.bf16 %v938_v60  ;;  %v3189_v54 = vld [vmem:[#allocation8_spill] sm:$0xff] }
 0x3fc   : > { %v2038_v11 = vpop.eup %2037  ;;  %2043 = vpow2.f32 %v1073_v9  ;;  %v972_v59 = vunpack.c.h.bf16 %v938_v60  ;;  %v987_v61 = vunpack.c.l.bf16 %v946_v35  ;;  %v2756_v63 = vsel %vm367_vm1, %v2743_v25, 0  ;;  %v3190_v60 = vld [vmem:[#allocation14_spill] sm:$0xff] }
 0x3fd   : > { %3187 = vst [vmem:[#allocation11_spill] sm:$0xff] %v2750_v10  ;;  %v2040_v14 = vpop.eup %2039  ;;  %v2758_v34 = vpack.c.bf16 %v2038_v11, %v2036_v45  ;;  %2045 = vpow2.f32 %v1075_v6  ;;  %v988_v1 = vunpack.c.h.bf16 %v946_v35  ;;  %v1037_v12 = vmul.f32 1.442695, %v971_v17 }
 0x3fe   : > { %v2042_v44 = vpop.eup %2041  ;;  %2047 = vpow2.f32 %v1105_v3  ;;  %v1039_v46 = vmul.f32 1.442695, %v972_v59  ;;  %v1069_v36 = vmul.f32 1.442695, %v987_v61  ;;  %v2763_v48 = vsel %vm367_vm1, %v2750_v10, 0 }
 0x3ff   : > { %1296 = vmatpush.bf16.xpose.msrb.mxu1 %v2756_v63  ;;  %v2767_v39 = vsel %vm367_vm1, %v2758_v34, 0  ;;  %2049 = vpow2.f32 %v1107_v13  ;;  %v1071_v21 = vmul.f32 1.442695, %v988_v1  ;;  %v908_v53 = vsub.f32 %v2455_v32, %v2582_v19 }
 0x400   : > { %2051 = vpow2.f32 %v1037_v12  ;;  %v873_v55 = vsub.f32 %v3188_v24, %v2582_v19  ;;  %v874_v28 = vsub.f32 %v3189_v54, %v2582_v19  ;;  %v2776_v15 = vpack.c.bf16 %v2042_v44, %v2040_v14 }
 0x401   : > { %1309 = vmatpush.bf16.xpose.msrb.mxu2 %v2763_v48  ;;  %2053 = vpow2.f32 %v1039_v46  ;;  %v889_v38 = vsub.f32 %v3190_v60, %v2582_v19  ;;  %v890_v9 = vsub.f32 %v2350_v7, %v2582_v19  ;;  %v954_v32 = vpack.c.bf16 %v908_v53, %v907_v40 }
 0x402   : > { %v2044_v6 = vpop.eup %2043  ;;  %2055 = vpow2.f32 %v1069_v36  ;;  %v937_v35 = vpack.c.bf16 %v874_v28, %v873_v55  ;;  %v905_v45 = vsub.f32 %v2423_v56, %v2582_v19  ;;  %v906_v11 = vsub.f32 %v2431_v4, %v2582_v19 }
 0x403   : > { %v2046_v3 = vpop.eup %2045  ;;  %1322 = vmatpush.bf16.xpose.msra.mxu3 %v2767_v39  ;;  %2057 = vpow2.f32 %v1071_v21  ;;  %v945_v13 = vpack.c.bf16 %v890_v9, %v889_v38  ;;  %v1003_v61 = vunpack.c.l.bf16 %v954_v32  ;;  %v1004_v7 = vunpack.c.h.bf16 %v954_v32 }
 0x404   : > { %v2048_v17 = vpop.eup %2047  ;;  %v2787_v59 = vpack.c.bf16 %v2046_v3, %v2044_v6  ;;  %v969_v14 = vunpack.c.l.bf16 %v937_v35  ;;  %v970_v40 = vunpack.c.h.bf16 %v937_v35  ;;  %v953_v46 = vpack.c.bf16 %v906_v11, %v905_v45 }
 0x405   : > { %v2050_v1 = vpop.eup %2049  ;;  %v985_v44 = vunpack.c.l.bf16 %v945_v13  ;;  %v986_v12 = vunpack.c.h.bf16 %v945_v13  ;;  %v2791_v36 = vsel %vm367_vm1, %v2776_v15, 0  ;;  %v1101_v53 = vmul.f32 1.442695, %v1003_v61 }
 0x406   : > { %v2052_v56 = vpop.eup %2051  ;;  %v2793_v21 = vpack.c.bf16 %v2050_v1, %v2048_v17  ;;  %v1103_v4 = vmul.f32 1.442695, %v1004_v7  ;;  %v1033_v55 = vmul.f32 1.442695, %v969_v14  ;;  %v1035_v54 = vmul.f32 1.442695, %v970_v40 }
 0x407   : > { %v2054_v24 = vpop.eup %2053  ;;  %1297 = vmatpush.bf16.xpose.msrb.mxu1 %v2791_v36  ;;  %v1001_v28 = vunpack.c.l.bf16 %v953_v46  ;;  %v935_v60 = vsub.f32 %v2557_v26, %v2582_v19  ;;  %v2800_v9 = vsel %vm367_vm1, %v2787_v59, 0  ;;  %2059 = vpow2.f32 %v1101_v53  ;;  %v3191_v17 = vld [vmem:[#allocation25_spill] sm:$0xff] }
 0x408   : > { %v2056_v38 = vpop.eup %2055  ;;  %v2804_v6 = vsel %vm367_vm1, %v2793_v21, 0  ;;  %v1065_v32 = vmul.f32 1.442695, %v985_v44  ;;  %2061 = vpow2.f32 %v1103_v4  ;;  %v1067_v45 = vmul.f32 1.442695, %v986_v12  ;;  %v3194_v12 = vld [vmem:[#allocation23_spill] sm:$0xff] }
 0x409   : > { %v2058_v35 = vpop.eup %2057  ;;  %1310 = vmatpush.bf16.xpose.msrb.mxu2 %v2800_v9  ;;  %v1002_v3 = vunpack.c.h.bf16 %v953_v46  ;;  %v936_v26 = vsub.f32 %v2573_v47, %v2582_v19  ;;  %v2809_v13 = vpack.c.bf16 %v2054_v24, %v2052_v56  ;;  %2063 = vpow2.f32 %v1033_v55  ;;  %v3193_v47 = vld [vmem:[#allocation21_spill] sm:$0xff] }
 0x40a   : > { %v1097_v11 = vmul.f32 1.442695, %v1001_v28  ;;  %v933_v61 = vsub.f32 %v3191_v17, %v2582_v19  ;;  %2065 = vpow2.f32 %v1035_v54  ;;  %v934_v1 = vsub.f32 %v2525_v49, %v2582_v19 }
 0x40b   : > { %1323 = vmatpush.bf16.xpose.msra.mxu3 %v2804_v6  ;;  %v1099_v7 = vmul.f32 1.442695, %v1002_v3  ;;  %v968_v14 = vpack.c.bf16 %v936_v26, %v935_v60  ;;  %v2816_v40 = vpack.c.bf16 %v2058_v35, %v2056_v38  ;;  %2067 = vpow2.f32 %v1065_v32 }
 0x40c   : > { %v931_v44 = vsub.f32 %v3193_v47, %v2582_v19  ;;  %v932_v46 = vsub.f32 %v3194_v12, %v2582_v19  ;;  %2069 = vpow2.f32 %v1067_v45  ;;  %v967_v4 = vpack.c.bf16 %v934_v1, %v933_v61 }
 0x40d   : > { %3192 = vst [vmem:[#allocation12_spill] sm:$0xff] %v2816_v40  ;;  %v1031_v56 = vunpack.c.l.bf16 %v968_v14  ;;  %v1032_v53 = vunpack.c.h.bf16 %v968_v14  ;;  %v2060_v24 = vpop.eup %2059  ;;  %v2824_v55 = vsel %vm367_vm1, %v2809_v13, 0  ;;  %2071 = vpow2.f32 %v1097_v11 }
 0x40e   : > { %v2062_v49 = vpop.eup %2061  ;;  %2073 = vpow2.f32 %v1099_v7  ;;  %v1029_v60 = vunpack.c.l.bf16 %v967_v4  ;;  %v2829_v32 = vsel %vm367_vm1, %v2816_v40, 0  ;;  %v1030_v45 = vunpack.c.h.bf16 %v967_v4  ;;  %v3196_v4 = vld [vmem:[#allocation20_spill] sm:$0xff] }
 0x40f   : > { %1298 = vmatpush.bf16.xpose.msrb.mxu1 %v2824_v55  ;;  %v1157_v54 = vmul.f32 1.442695, %v1031_v56  ;;  %v1159_v28 = vmul.f32 1.442695, %v1032_v53  ;;  %v2064_v38 = vpop.eup %2063  ;;  %v2831_v35 = vpack.c.bf16 %v2062_v49, %v2060_v24  ;;  %v966_v11 = vpack.c.bf16 %v932_v46, %v931_v44  ;;  %v3195_v44 = vld [vmem:[#allocation19_spill] sm:$0xff] }
 0x410   : > { %v2066_v3 = vpop.eup %2065  ;;  %v1153_v26 = vmul.f32 1.442695, %v1029_v60  ;;  %v1155_v14 = vmul.f32 1.442695, %v1030_v45  ;;  %v929_v46 = vsub.f32 %v3195_v44, %v2582_v19  ;;  %v930_v24 = vsub.f32 %v3196_v4, %v2582_v19  ;;  %v3197_v44 = vld [vmem:[#allocation17_spill] sm:$0xff]  ;;  %v3198_v4 = vld [vmem:[#allocation18_spill] sm:$0xff] }
 0x411   : > { %1311 = vmatpush.bf16.xpose.msrb.mxu2 %v2829_v32  ;;  %2075 = vpow2.f32 %v1157_v54  ;;  %v2068_v17 = vpop.eup %2067  ;;  %v2836_v61 = vsel %vm367_vm1, %v2831_v35, 0  ;;  %v2838_v7 = vpack.c.bf16 %v2066_v3, %v2064_v38  ;;  %v1027_v53 = vunpack.c.l.bf16 %v966_v11 }
 0x412   : > { %2077 = vpow2.f32 %v1159_v28  ;;  %v2070_v1 = vpop.eup %2069  ;;  %v1028_v28 = vunpack.c.h.bf16 %v966_v11 }
 0x413   : > { %1324 = vmatpush.bf16.xpose.msra.mxu3 %v2836_v61  ;;  %v2072_v47 = vpop.eup %2071  ;;  %v2841_v12 = vpack.c.bf16 %v2070_v1, %v2068_v17  ;;  %2079 = vpow2.f32 %v1153_v26  ;;  %v2849_v49 = vsel %vm367_vm1, %v2838_v7, 0  ;;  %v1149_v26 = vmul.f32 1.442695, %v1027_v53 }
 0x414   : > { %v2074_v56 = vpop.eup %2073  ;;  %2081 = vpow2.f32 %v1155_v14  ;;  %v965_v17 = vpack.c.bf16 %v930_v24, %v929_v46  ;;  %v1151_v11 = vmul.f32 1.442695, %v1028_v28  ;;  %v927_v46 = vsub.f32 %v3197_v44, %v2582_v19 }
 0x415   : > { %v2851_v54 = vpack.c.bf16 %v2074_v56, %v2072_v47  ;;  %v2856_v45 = vsel %vm367_vm1, %v2841_v12, 0  ;;  %2083 = vpow2.f32 %v1149_v26  ;;  %v928_v24 = vsub.f32 %v3198_v4, %v2582_v19 }
 0x416   : > { %v1025_v53 = vunpack.c.l.bf16 %v965_v17  ;;  %2085 = vpow2.f32 %v1151_v11  ;;  %v1026_v28 = vunpack.c.h.bf16 %v965_v17 }
 0x417   : > { %v2076_v60 = vpop.eup %2075  ;;  %1299 = vmatpush.bf16.xpose.msrb.mxu1 %v2849_v49  ;;  %v2863_v1 = vsel %vm367_vm1, %v2851_v54, 0  ;;  %v964_v44 = vpack.c.bf16 %v928_v24, %v927_v46  ;;  %v3201_v24 = vld [vmem:[#allocation16_spill] sm:$0xff] }
 0x418   : > { %v2078_v38 = vpop.eup %2077  ;;  %v1145_v26 = vmul.f32 1.442695, %v1025_v53  ;;  %v1147_v11 = vmul.f32 1.442695, %v1026_v28  ;;  %v3200_v53 = vld [vmem:[#allocation15_spill] sm:$0xff] }
 0x419   : > { %1312 = vmatpush.bf16.xpose.msrb.mxu2 %v2856_v45  ;;  %v2859_v3 = vpack.c.bf16 %v2078_v38, %v2076_v60  ;;  %v2080_v14 = vpop.eup %2079  ;;  %v3147_v60 = vmov 1065369472   ;;  %v925_v46 = vsub.f32 %v3200_v53, %v2582_v19  ;;  %v1024_v28 = vunpack.c.h.bf16 %v964_v44 }
 0x41a   : > { %v2082_v56 = vpop.eup %2081  ;;  %2087 = vpow2.f32 %v1145_v26 }
 0x41b   : > { %1325 = vmatpush.bf16.xpose.msra.mxu3 %v2863_v1  ;;  %v2869_v47 = vsel %vm367_vm1, %v2859_v3, 0  ;;  %v2880_v38 = vpack.c.bf16 %v2082_v56, %v2080_v14  ;;  %v2084_v17 = vpop.eup %2083  ;;  %v1023_v56 = vunpack.c.l.bf16 %v964_v44  ;;  %2089 = vpow2.f32 %v1147_v11  ;;  %v3203_v11 = vld [vmem:[#allocation26_spill] sm:$0xff] }
 0x41c   : > { %v2086_v14 = vpop.eup %2085  ;;  %v1143_v26 = vmul.f32 1.442695, %v1024_v28 }
 0x41d   : > { %v2890_v4 = vsel %vm367_vm1, %v2880_v38, 0 }
 0x41e   : > { %1870 = vmatmul.msk.bf16.vlgmr.msrb.gmra.mxu1 %vm367_vm1, %v3147_v60  ;;  %3199 = vst [vmem:[#allocation9_spill] sm:$0xff] %v2890_v4 }
 0x41f   : > { %1331 = vmatpush.bf16.xpose.msra.mxu1 %v2869_v47 }
 0x420   : > { %1871 = vmatmul.msk.bf16.vlgmr.msrb.gmra.mxu2 %vm367_vm1, %v3147_v60 }
 0x421   : > { %1344 = vmatpush.bf16.msra.mxu2 %v2626_v43 }
 0x422   : > { %1872 = vmatmul.msk.bf16.vlgmr.msra.gmra.mxu3 %vm367_vm1, %v3147_v60  ;;  %v2899_v60 = vpack.c.bf16 %v2086_v14, %v2084_v17  ;;  %v923_v17 = vsub.f32 %v3203_v11, %v2582_v19 }
 0x423   : > { %1357 = vmatpush.bf16.msrb.mxu3 %v2632_v57 }
 0x424   : > { %v2905_v53 = vsel %vm367_vm1, %v2899_v60, 0 }
 0x425   : > { %1345 = vmatpush.bf16.msra.mxu2 %v2650_v42  ;;  %3202 = vst [vmem:[#allocation10_spill] sm:$0xff] %v2905_v53 }
 0x427   : > { %1358 = vmatpush.bf16.msrb.mxu3 %v2655_v16  ;;  %1332 = vmatpush.bf16.xpose.msra.mxu1 %v2890_v4  ;;  %v1141_v16 = vmul.f32 1.442695, %v1023_v56 }
 0x429   : > { %1346 = vmatpush.bf16.msra.mxu2 %v2670_v50  ;;  %v926_v50 = vsub.f32 %v3201_v24, %v2582_v19  ;;  %2091 = vpow2.f32 %v1141_v16 }
 0x42a   : > { %2093 = vpow2.f32 %v1143_v26  ;;  %v3206_v26 = vld [vmem:[#allocation24_spill] sm:$0xff] }
 0x42b   : > { %1359 = vmatpush.bf16.msrb.mxu3 %v2679_v62  ;;  %v963_v4 = vpack.c.bf16 %v926_v50, %v925_v46  ;;  %v2088_v62 = vpop.eup %2087  ;;  %v3204_v50 = vld [vmem:[#allocation27_spill] sm:$0xff] }
 0x42c   : > { %v2090_v42 = vpop.eup %2089  ;;  %v924_v14 = vsub.f32 %v3204_v50, %v2582_v19 }
 0x42d   : > { %1347 = vmatpush.bf16.msra.mxu2 %v2709_v23  ;;  %v1021_v44 = vunpack.c.l.bf16 %v963_v4  ;;  %v1022_v56 = vunpack.c.h.bf16 %v963_v4  ;;  %v2914_v46 = vpack.c.bf16 %v2090_v42, %v2088_v62  ;;  %v3205_v62 = vld [vmem:[#allocation22_spill] sm:$0xff] }
 0x42e   : > { %v962_v28 = vpack.c.bf16 %v924_v14, %v923_v17  ;;  %v921_v4 = vsub.f32 %v3205_v62, %v2582_v19  ;;  %v3207_v14 = vmov 1065369472  }
 0x42f   : > { %1360 = vmatpush.bf16.msrb.mxu3 %v2712_v29  ;;  %1333 = vmatpush.bf16.xpose.msra.mxu1 %v2905_v53  ;;  %v1137_v24 = vmul.f32 1.442695, %v1021_v44  ;;  %v1139_v16 = vmul.f32 1.442695, %v1022_v56  ;;  %v2920_v11 = vsel %vm367_vm1, %v2914_v46, 0  ;;  %v922_v44 = vsub.f32 %v3206_v26, %v2582_v19 }
 0x430   : > { %v1019_v42 = vunpack.c.l.bf16 %v962_v28  ;;  %v1020_v17 = vunpack.c.h.bf16 %v962_v28 }
 0x431   : > { %1348 = vmatpush.bf16.msra.mxu2 %v2743_v25  ;;  %2095 = vpow2.f32 %v1137_v24  ;;  %v961_v24 = vpack.c.bf16 %v922_v44, %v921_v4 }
 0x432   : > { %2097 = vpow2.f32 %v1139_v16  ;;  %v1133_v56 = vmul.f32 1.442695, %v1019_v42  ;;  %v1135_v62 = vmul.f32 1.442695, %v1020_v17 }
 0x433   : > { %1361 = vmatpush.bf16.msrb.mxu3 %v2750_v10  ;;  %v2092_v10 = vpop.eup %2091  ;;  %v1018_v28 = vunpack.c.h.bf16 %v961_v24 }
 0x434   : > { %v2094_v53 = vpop.eup %2093  ;;  %2099 = vpow2.f32 %v1133_v56 }
 0x435   : > { %1349 = vmatpush.bf16.msra.mxu2 %v2776_v15  ;;  %v2930_v50 = vpack.c.bf16 %v2094_v53, %v2092_v10  ;;  %v1017_v53 = vunpack.c.l.bf16 %v961_v24  ;;  %2101 = vpow2.f32 %v1135_v62  ;;  %v1131_v4 = vmul.f32 1.442695, %v1018_v28 }
 0x437   : > { %1362 = vmatpush.bf16.msrb.mxu3 %v2787_v59  ;;  %1334 = vmatpush.bf16.xpose.msra.mxu1 %v2920_v11  ;;  %v2937_v19 = vsel %vm367_vm1, %v2930_v50, 0  ;;  %v1129_v42 = vmul.f32 1.442695, %v1017_v53 }
 0x439   : > { %1350 = vmatpush.bf16.msra.mxu2 %v2809_v13  ;;  %2103 = vpow2.f32 %v1129_v42 }
 0x43a   : > { %2105 = vpow2.f32 %v1131_v4 }
 0x43b   : > { %1363 = vmatpush.bf16.msrb.mxu3 %v2816_v40  ;;  %v2096_v40 = vpop.eup %2095 }
 0x43c   : > { %v2098_v10 = vpop.eup %2097 }
 0x43d   : > { %1351 = vmatpush.bf16.msra.mxu2 %v2838_v7  ;;  %v2944_v16 = vpack.c.bf16 %v2098_v10, %v2096_v40  ;;  %v2100_v26 = vpop.eup %2099 }
 0x43e   : > { %v2102_v17 = vpop.eup %2101 }
 0x43f   : > { %1364 = vmatpush.bf16.msrb.mxu3 %v2841_v12  ;;  %1335 = vmatpush.bf16.xpose.msra.mxu1 %v2937_v19  ;;  %v2949_v44 = vsel %vm367_vm1, %v2944_v16, 0  ;;  %v2955_v40 = vpack.c.bf16 %v2102_v17, %v2100_v26  ;;  %v2104_v56 = vpop.eup %2103 }
 0x440   : > { %1352 = vmatmul.bf16.vlgmr.msra.gmra.mxu2 %v3207_v14  ;;  %v2106_v62 = vpop.eup %2105 }
 0x441   : > { %1370 = vmatpush.bf16.msrb.mxu2 %v2639_v37  ;;  %v2960_v24 = vsel %vm367_vm1, %v2955_v40, 0  ;;  %v2966_v10 = vpack.c.bf16 %v2106_v62, %v2104_v56 }
 0x442   : > { %1365 = vmatmul.bf16.vlgmr.msrb.gmra.mxu3 %v3207_v14 }
 0x443   : > { %1383 = vmatpush.bf16.msra.mxu3 %v2859_v3  ;;  %v2971_v53 = vsel %vm367_vm1, %v2966_v10, 0 }
 0x445   : > { %1371 = vmatpush.bf16.msrb.mxu2 %v2661_v20 }
 0x447   : > { %1384 = vmatpush.bf16.msra.mxu3 %v2880_v38  ;;  %1336 = vmatpush.bf16.xpose.msra.mxu1 %v2949_v44 }
 0x449   : > { %1372 = vmatpush.bf16.msrb.mxu2 %v2692_v8 }
 0x44b   : > { %1385 = vmatpush.bf16.msra.mxu3 %v2899_v60 }
 0x44d   : > { %1373 = vmatpush.bf16.msrb.mxu2 %v2729_v58 }
 0x44f   : > { %1386 = vmatpush.bf16.msra.mxu3 %v2914_v46  ;;  %1337 = vmatpush.bf16.xpose.msra.mxu1 %v2960_v24 }
 0x451   : > { %1374 = vmatpush.bf16.msrb.mxu2 %v2758_v34 }
 0x453   : > { %1387 = vmatpush.bf16.msra.mxu3 %v2930_v50 }
 0x455   : > { %1375 = vmatpush.bf16.msrb.mxu2 %v2793_v21 }
 0x457   : > { %1388 = vmatpush.bf16.msra.mxu3 %v2944_v16  ;;  %1338 = vmatpush.bf16.xpose.msra.mxu1 %v2971_v53 }
 0x459   : > { %1376 = vmatpush.bf16.msrb.mxu2 %v2831_v35 }
 0x45b   : > { %1389 = vmatpush.bf16.msra.mxu3 %v2955_v40 }
 0x45d   : > { %1377 = vmatpush.bf16.msrb.mxu2 %v2851_v54 }
 0x45e   : > { %1873 = vmatmul.msk.bf16.vlgmr.msra.gmra.mxu1 %vm367_vm1, %v3207_v14 }
 0x45f   : > { %1390 = vmatpush.bf16.msra.mxu3 %v2966_v10  ;;  %1404 = vmatpush.bf16.xpose.msrb.mxu1 %v2630_v22  ;;  %v3009_v22 = vld [vmem:[%s291_s12 + $0x8] sm:$0xff] }
 0x460   : > { %1378 = vmatmul.bf16.vlgmr.msrb.gmra.mxu2 %v3207_v14 }
 0x461   : > { %1418 = vmatpush.bf16.xpose.msra.mxu2 %v2637_v30  ;;  %v3208_v30 = vld [vmem:[#allocation28_spill] sm:$0xff] }
 0x462   : > { %1391 = vmatmul.bf16.vlgmr.msra.gmra.mxu3 %v3207_v14 }
 0x463   : > { %1432 = vmatpush.bf16.xpose.msrb.mxu3 %v2648_v31  ;;  %v3209_v31 = vld [vmem:[#allocation29_spill] sm:$0xff] }
 0x467   : > { %1405 = vmatpush.bf16.xpose.msrb.mxu1 %v2659_v18  ;;  %v3212_v18 = vld [vmem:[#allocation13_spill] sm:$0xff] }
 0x469   : > { %1419 = vmatpush.bf16.xpose.msra.mxu2 %v2668_v33  ;;  %v3213_v33 = vld [vmem:[#allocation10_spill] sm:$0xff] }
 0x46b   : > { %1433 = vmatpush.bf16.xpose.msrb.mxu3 %v2677_v51  ;;  %v3214_v51 = vld [vmem:[#allocation11_spill] sm:$0xff] }
 0x46f   : > { %1406 = vmatpush.bf16.xpose.msrb.mxu1 %v2690_v52 }
 0x471   : > { %1420 = vmatpush.bf16.xpose.msra.mxu2 %v2700_v0  ;;  %v1884_v0 = vld [vmem:[%s2274_s5 + $0x20] sm:$0xf] }
 0x473   : > { %1434 = vmatpush.bf16.xpose.msrb.mxu3 %v2704_v2  ;;  %v1906_v2 = vld [vmem:[%s2274_s5 + $0x2c] sm:$0xf0] }
 0x477   : > { %1407 = vmatpush.bf16.xpose.msrb.mxu1 %v2719_v41  ;;  %v1885_v41 = vor.u32 %v1906_v2, %v1884_v0  ;;  %v1571_v0 = vld [vmem:[#allocation4] sm:$0xff] }
 0x479   : > { %1421 = vmatpush.bf16.xpose.msra.mxu2 %v2723_v5  ;;  %v1904_v5 = vld [vmem:[%s2274_s5 + $0x24] sm:$0xf] }
 0x47b   : > { %1435 = vmatpush.bf16.xpose.msrb.mxu3 %v2747_v27 }
 0x47f   : > { %1408 = vmatpush.bf16.xpose.msrb.mxu1 %v2756_v63 }
 0x481   : > { %1422 = vmatpush.bf16.xpose.msra.mxu2 %v2763_v48 }
 0x483   : > { %1436 = vmatpush.bf16.xpose.msrb.mxu3 %v2767_v39  ;;  %v1892_v39 = vld [vmem:[%s2274_s5 + $0x28] sm:$0xf] }
 0x487   : > { %1409 = vmatpush.bf16.xpose.msrb.mxu1 %v2791_v36 }
 0x489   : > { %1423 = vmatpush.bf16.xpose.msra.mxu2 %v2800_v9 }
 0x48b   : > { %1437 = vmatpush.bf16.xpose.msrb.mxu3 %v2804_v6 }
 0x48f   : > { %1410 = vmatpush.bf16.xpose.msrb.mxu1 %v2824_v55 }
 0x491   : > { %1424 = vmatpush.bf16.xpose.msra.mxu2 %v2829_v32 }
 0x493   : > { %1438 = vmatpush.bf16.xpose.msrb.mxu3 %v2836_v61  ;;  %v1560_v61 = vld [vmem:[#allocation3] sm:$0x1] }
 0x497   : > { %1411 = vmatpush.bf16.xpose.msrb.mxu1 %v2849_v49 }
 0x499   : > { %1425 = vmatpush.bf16.xpose.msra.mxu2 %v2856_v45 }
 0x49b   : > { %1439 = vmatpush.bf16.xpose.msrb.mxu3 %v2863_v1 }
 0x49e   : > { %1878 = vmatmul.msk.bf16.vlgmr.msrb.gmra.mxu1 %vm367_vm1, %v3009_v22 }
 0x49f   : > { %1446 = vmatpush.bf16.xpose.msra.mxu1 %v2869_v47 }
 0x4a0   : > { %1879 = vmatmul.msk.bf16.vlgmr.msra.gmra.mxu2 %vm367_vm1, %v3009_v22 }
 0x4a1   : > { %1504 = vmatpush.bf16.msrb.mxu2 %v2626_v43  ;;  %v3210_v43 = vld [vmem:[#allocation30_spill] sm:$0xff] }
 0x4a2   : > { %1880 = vmatmul.msk.bf16.vlgmr.msrb.gmra.mxu3 %vm367_vm1, %v3009_v22 }
 0x4a3   : > { %1518 = vmatpush.bf16.msra.mxu3 %v2632_v57  ;;  %v3211_v57 = vld [vmem:[#allocation9_spill] sm:$0xff]  ;;  %v3041_v52 = vpop.f32.mrf.mxu2 }
 0x4a4   : > { %2107 = vrcp.f32 %v3041_v52 }
 0x4a5   : > { %1505 = vmatpush.bf16.msrb.mxu2 %v3208_v30 }
 0x4a7   : > { %1519 = vmatpush.bf16.msra.mxu3 %v3209_v31  ;;  %1447 = vmatpush.bf16.xpose.msra.mxu1 %v3211_v57 }
 0x4a9   : > { %1506 = vmatpush.bf16.msrb.mxu2 %v3210_v43 }
 0x4ab   : > { %1520 = vmatpush.bf16.msra.mxu3 %v3212_v18  ;;  %v1316_v63 = vpop.f32.mrf.mxu2 }
 0x4ad   : > { %1507 = vmatpush.bf16.msrb.mxu2 %v2709_v23  ;;  %v3046_v23 = vpop.f32.mrf.mxu3 }
 0x4af   : > { %1521 = vmatpush.bf16.msra.mxu3 %v2712_v29  ;;  %1448 = vmatpush.bf16.xpose.msra.mxu1 %v3213_v33  ;;  %v3215_v29 = vld [vmem:[#allocation12_spill] sm:$0xff] }
 0x4b1   : > { %1508 = vmatpush.bf16.msrb.mxu2 %v2743_v25  ;;  %v1886_v25 = vld [vmem:[%s2274_s5 + $0x30] sm:$0xf0] }
 0x4b2   : > { %v1889_v27 = vor.u32 %v1904_v5, %v1886_v25 }
 0x4b3   : > { %1522 = vmatpush.bf16.msra.mxu3 %v3214_v51 }
 0x4b5   : > { %1509 = vmatpush.bf16.msrb.mxu2 %v2776_v15  ;;  %v1329_v48 = vpop.f32.mrf.mxu3 }
 0x4b7   : > { %1523 = vmatpush.bf16.msra.mxu3 %v2787_v59  ;;  %1449 = vmatpush.bf16.xpose.msra.mxu1 %v2920_v11  ;;  %v1905_v59 = vld [vmem:[%s2274_s5 + $0x2c] sm:$0xf] }
 0x4b9   : > { %1510 = vmatpush.bf16.msrb.mxu2 %v2809_v13  ;;  %v1564_v13 = vpop.permute.xlu2 %1563 }
 0x4ba   : > { %v1566_v32 = vperm.slane %v1564_v13, 0 }
 0x4bb   : > { %1524 = vmatpush.bf16.msra.mxu3 %v3215_v29 }
 0x4bd   : > { %1511 = vmatpush.bf16.msrb.mxu2 %v2838_v7 }
 0x4bf   : > { %1525 = vmatpush.bf16.msra.mxu3 %v2841_v12  ;;  %1450 = vmatpush.bf16.xpose.msra.mxu1 %v2937_v19 }
 0x4c0   : > { %1512 = vmatmul.bf16.vlgmr.msrb.gmra.mxu2 %v1885_v41 }
 0x4c1   : > { %1532 = vmatpush.bf16.msra.mxu2 %v2639_v37  ;;  %v1301_v37 = vpop.f32.mrf.mxu1  ;;  %v1576_v2 = vpop.permute.xlu2 %1575 }
 0x4c2   : > { %1526 = vmatmul.bf16.vlgmr.msra.gmra.mxu3 %v1889_v27  ;;  %2109 = vrcp.f32 %v1301_v37 }
 0x4c3   : > { %1546 = vmatpush.bf16.msrb.mxu3 %v2859_v3  ;;  %2111 = vrcp.f32 %v3046_v23  ;;  %v1578_v23 = vmul.f32 %v1576_v2, %v1571_v0 }
 0x4c5   : > { %1533 = vmatpush.bf16.msra.mxu2 %v2661_v20  ;;  %v1353_v20 = vpop.f32.mrf.mxu2 }
 0x4c7   : > { %1547 = vmatpush.bf16.msrb.mxu3 %v2880_v38  ;;  %1451 = vmatpush.bf16.xpose.msra.mxu1 %v2949_v44  ;;  %v2108_v38 = vpop.eup %2107 }
 0x4c9   : > { %1534 = vmatpush.bf16.msra.mxu2 %v2692_v8  ;;  %v1366_v8 = vpop.f32.mrf.mxu3  ;;  %v1303_v15 = vpop.f32.mrf.mxu1 }
 0x4ca   : > { %v1367_v55 = vadd.f32 %v1366_v8, %v1353_v20 }
 0x4cb   : > { %1548 = vmatpush.bf16.msrb.mxu3 %v2899_v60 }
 0x4cd   : > { %1535 = vmatpush.bf16.msra.mxu2 %v2729_v58  ;;  %v1907_v58 = vld [vmem:[%s2274_s5 + $0x34] sm:$0xf0]  ;;  %v1355_v36 = vpop.f32.mrf.mxu2 }
 0x4ce   : > { %v1893_v9 = vor.u32 %v1907_v58, %v1892_v39  ;;  %v1572_v58 = vld [vmem:[#allocation4 + $0x8] sm:$0xff] }
 0x4cf   : > { %1549 = vmatpush.bf16.msrb.mxu3 %v2914_v46  ;;  %1452 = vmatpush.bf16.xpose.msra.mxu1 %v2960_v24  ;;  %v2110_v46 = vpop.eup %2109 }
 0x4d0   : > { %v1464_v14 = vperm.slane %v2110_v46, 0 }
 0x4d1   : > { %1536 = vmatpush.bf16.msra.mxu2 %v2758_v34  ;;  %v1894_v34 = vld [vmem:[%s2274_s5 + $0x38] sm:$0xf0]  ;;  %v1368_v6 = vpop.f32.mrf.mxu3 }
 0x4d2   : > { %v1579_v6 = vmul.f32 %v1576_v2, %v1572_v58 }
 0x4d3   : > { %1550 = vmatpush.bf16.msrb.mxu3 %v2930_v50  ;;  %v1465_v50 = vperm.slane %v2108_v38, 0 }
 0x4d5   : > { %1537 = vmatpush.bf16.msra.mxu2 %v2793_v21  ;;  %v1897_v21 = vor.u32 %v1905_v59, %v1894_v34 }
 0x4d7   : > { %1551 = vmatpush.bf16.msrb.mxu3 %v2944_v16  ;;  %1453 = vmatpush.bf16.xpose.msra.mxu1 %v2971_v53 }
 0x4d9   : > { %1538 = vmatpush.bf16.msra.mxu2 %v2831_v35 }
 0x4db   : > { %1552 = vmatpush.bf16.msrb.mxu3 %v2955_v40  ;;  %v1340_v35 = vpop.f32.mrf.mxu1 }
 0x4dc   : > { %2113 = vrcp.f32 %v1340_v35 }
 0x4dd   : > { %1539 = vmatpush.bf16.msra.mxu2 %v2851_v54  ;;  %v1567_v54 = vmul.f32 %v1566_v32, %v1560_v61 }
 0x4de   : > { %1881 = vmatmul.msk.bf16.vlgmr.msra.gmra.mxu1 %vm367_vm1, %v3009_v22  ;;  %v2112_v22 = vpop.eup %2111 }
 0x4df   : > { %1553 = vmatpush.bf16.msrb.mxu3 %v2966_v10  ;;  %v1466_v43 = vperm.slane %v2112_v22, 0 }
 0x4e0   : > { %1540 = vmatmul.bf16.vlgmr.msra.gmra.mxu2 %v1893_v9 }
 0x4e2   : > { %1554 = vmatmul.bf16.vlgmr.msrb.gmra.mxu3 %v1897_v21  ;;  %v2114_v30 = vpop.eup %2113 }
 0x4e3   : > { %v1379_v7 = vpop.f32.mrf.mxu2  ;;  %v1342_v1 = vpop.f32.mrf.mxu1  ;;  %v1467_v57 = vperm.slane %v2114_v30, 0 }
 0x4e4   : > { %v1380_v12 = vadd.f32 %v1379_v7, %v1367_v55 }
 0x4e5   : > { %v1392_v49 = vpop.f32.mrf.mxu3 }
 0x4e6   : > { %v1393_v45 = vadd.f32 %v1392_v49, %v1380_v12 }
 0x4e8   : > { %v1568_v3 = vadd.f32 %v1567_v54, %v1393_v45 }
 0x4ea   : > { %1570 = vst.msk [vmem:[#allocation3] sm:$0x1] %vm365_vm3, %v1568_v3 }
 0x4eb   : > { %v1381_v47 = vpop.f32.mrf.mxu2 }
 0x4ed   : > { %v1394_v60 = vpop.f32.mrf.mxu3 }
 0x4f1   : > { %v1589_v41 = vld [vmem:[#allocation3] sm:$0x1] }
 0x4f2   : > { %2115 = vrcp.f32 %v1589_v41 }
 0x4f8   : > { %v2116_v36 = vpop.eup %2115 }
 0x4f9   : > { %v1594_v13 = vperm.slane %v2116_v36, 0 }
 0x51b   : > { %v1413_v11 = vpop.f32.mrf.mxu1 }
 0x51c   : > { %v1468_v28 = vmul.f32 %v1464_v14, %v1413_v11 }
 0x523   : > { %v1427_v19 = vpop.f32.mrf.mxu2  ;;  %v1415_v4 = vpop.f32.mrf.mxu1 }
 0x524   : > { %v1469_v16 = vmul.f32 %v1465_v50, %v1427_v19  ;;  %v1472_v44 = vmul.f32 %v1464_v14, %v1415_v4 }
 0x525   : > { %v1441_v56 = vpop.f32.mrf.mxu3 }
 0x526   : > { %v1476_v42 = vpack.c.bf16 %v1469_v16, %v1468_v28  ;;  %v1470_v33 = vmul.f32 %v1466_v43, %v1441_v56 }
 0x528   : > { %1480 = vst [vmem:[%s3087_s28] sm:$0xff] %v1476_v42 }
 0x52b   : > { %v1429_v26 = vpop.f32.mrf.mxu2 }
 0x52c   : > { %v1473_v17 = vmul.f32 %v1465_v50, %v1429_v26 }
 0x52d   : > { %v1443_v24 = vpop.f32.mrf.mxu3 }
 0x52e   : > { %v1478_v40 = vpack.c.bf16 %v1473_v17, %v1472_v44  ;;  %v1474_v20 = vmul.f32 %v1466_v43, %v1443_v24 }
 0x530   : > { %1482 = vst [vmem:[%s3087_s28 + $0x10] sm:$0xff] %v1478_v40 }
 0x543   : > { %v1513_v62 = vpop.f32.mrf.mxu2 }
 0x545   : > { %v1527_v10 = vpop.f32.mrf.mxu3 }
 0x546   : > { %v1528_v51 = vadd.f32 %v1527_v10, %v1513_v62 }
 0x54b   : > { %v1515_v53 = vpop.f32.mrf.mxu2 }
 0x54d   : > { %v1529_v31 = vpop.f32.mrf.mxu3 }
 0x54e   : > { %v1530_v8 = vadd.f32 %v1529_v31, %v1515_v53 }
 0x55b   : > { %v1455_v18 = vpop.f32.mrf.mxu1 }
 0x55c   : > { %v1471_v52 = vmul.f32 %v1467_v57, %v1455_v18 }
 0x55e   : > { %v1477_v5 = vpack.c.bf16 %v1471_v52, %v1470_v33 }
 0x560   : > { %1481 = vst [vmem:[%s3087_s28 + $0x8] sm:$0xff] %v1477_v5 }
 0x563   : > { %v1541_v29 = vpop.f32.mrf.mxu2  ;;  %v1457_v37 = vpop.f32.mrf.mxu1 }
 0x564   : > { %v1542_v25 = vadd.f32 %v1541_v29, %v1528_v51  ;;  %v1475_v39 = vmul.f32 %v1467_v57, %v1457_v37 }
 0x565   : > { %v1555_v27 = vpop.f32.mrf.mxu3 }
 0x566   : > { %v1556_v63 = vadd.f32 %v1555_v27, %v1542_v25  ;;  %v1479_v59 = vpack.c.bf16 %v1475_v39, %v1474_v20 }
 0x568   : > { %v1580_v48 = vadd.f32 %v1578_v23, %v1556_v63  ;;  %1483 = vst [vmem:[%s3087_s28 + $0x18] sm:$0xff] %v1479_v59 }
 0x56a   : > { %1582 = vst.msk [vmem:[#allocation4] sm:$0xff] %vm367_vm1, %v1580_v48 }
 0x56b   : > { %v1543_v15 = vpop.f32.mrf.mxu2 }
 0x56c   : > { %v1544_v34 = vadd.f32 %v1543_v15, %v1530_v8 }
 0x56d   : > { %v1557_v9 = vpop.f32.mrf.mxu3 }
 0x56e   : > { %v1558_v21 = vadd.f32 %v1557_v9, %v1544_v34 }
 0x570   : > { %v1581_v55 = vadd.f32 %v1579_v6, %v1558_v21 }
 0x571   : > { %v1591_v32 = vld [vmem:[#allocation4] sm:$0xff] }
 0x572   : > { %v1596_v35 = vmul.f32 %v1594_v13, %v1591_v32  ;;  %1583 = vst.msk [vmem:[#allocation4 + $0x8] sm:$0xff] %vm367_vm1, %v1581_v55 }
 0x574   : > { %v1598_v61 = vpack.c.bf16 %v1596_v35, %v1596_v35 }
 0x576   : > { %1601 = vst.msk [vmem:[%s356_s30] sm:$0xf] %vm1600_vm4, %v1598_v61 }
 0x579   : > { %v1592_v7 = vld [vmem:[#allocation4 + $0x8] sm:$0xff] }
 0x57a   : > { %v1597_v12 = vmul.f32 %v1594_v13, %v1592_v7 }
 0x57c   : > { %v1599_v49 = vpack.c.bf16 %v1597_v12, %v1597_v12 }
 0x57e   : > { %1602 = vst.msk [vmem:[%s356_s30 + $0x4] sm:$0xf] %vm1600_vm4, %v1599_v49 }
 0x57f PF: > { %s14_s18 = sadd.s32 1, %s2171_s18   ;;  %s3216_s12 = smov %s2151_s13 }
 0x580   : > { %p11_p12 = scmp.ge.s32.totalorder %s14_s18, 6   ;;  %s3217_s13 = smov %s2252_s26 }
 0x581   : > { %s3218_s14 = smov %s2163_s16  ;;  %s3219_s15 = smov %s2167_s17 }
 0x582   : > { %s3220_s16 = smov %s3223_s19  ;;  %s3221_s17 = smov %s3227_s20 }
 0x583   :  { %13 = sbr.rel (!%p11_p12) target bundleno = 4 (0x4), region = 157 }

// kernel: bidirection_attention.8
= control target key start
LH: loop header
LB: loop body
LE: loop exit
PB: predicated region body
PF: predicated region fallthrough
CT: control target
= control target key end

     0   :  { %s500_s9 = smov 0   ;;  %s502_s10 = smov 0   ;;  %s540_s0 = inlined_call_operand.vmem [shape: bf16[2,32,512], index: 0, kind: input, shape index: {}]   ;;  %s541_s1 = inlined_call_operand.vmem [shape: bf16[8,32], index: 1, kind: input, shape index: {}]   ;;  %s542_s2 = inlined_call_operand.vmem [shape: f32[2,8,512], index: 2, kind: output, shape index: {}]  }
   0x1   :  { %s504_s11 = smov 0  }
   0x2 LB: > { %s24_s12 = sadd.s32 1, %s479_s10  ;;  %p384_p0 = scmp.ge.s32.totalorder %s483_s11, 1  ;;  %s483_s11 = sphi %s504_s11, %s12_s11   ;;  %s479_s10 = sphi %s502_s10, %s544_s10   ;;  %s475_s9 = sphi %s500_s9, %s543_s9  }
   0x3   : > { %p26_p1 = scmp.ge.s32.totalorder %s24_s12, 2  ;;  %p133_p2 = scmp.lt.s32.totalorder %s483_s11, 3 }
   0x5   : > { %s546_s12 = smov (%p26_p1, %s24_s12), 0  ;;  %p134_p3 = pnand %p384_p0, %p133_p2 }
   0x6   : > { %p164_p4 = scmp.lt.s32.totalorder (!%p134_p3), %s475_s9, 1 }
   0x7   : > { %137 = sbr.rel (%p134_p3) target bundleno = 167 (0xa7), region = 28 }
   0xc   : > { %s548_s9 = smov (!%p164_p4, %s475_s9), 1  ;;  %v192_v24 = vld [vmem:[%s541_s1] sm:$0xf]  ;;  %vm233_vm0 = vcmask 261120  }
   0xd   : > { %s427_s13 = sshll.u32 %s548_s9, 6  ;;  %s428_s19 = sshll.u32 %s548_s9, 5 }
   0xe   : > { %s171_s16 = scalar_lea.vmem %s540_s0, %s427_s13  ;;  %s181_s22 = scalar_lea.vmem %s542_s2, %s428_s19 }
   0xf   : > { %v407_v0 = vld [vmem:[%s171_s16 + $0x20] sm:$0xf]  ;;  %v435_v1 = vld [vmem:[%s171_s16 + $0x2c] sm:$0xf0]  ;;  %v433_v2 = vld [vmem:[%s171_s16 + $0x24] sm:$0xf] }
  0x10   : > { %v408_v3 = vor.u32 %v435_v1, %v407_v0  ;;  %v409_v4 = vld [vmem:[%s171_s16 + $0x30] sm:$0xf0]  ;;  %v415_v5 = vld [vmem:[%s171_s16 + $0x28] sm:$0xf]  ;;  %v436_v6 = vld [vmem:[%s171_s16 + $0x34] sm:$0xf0] }
  0x11   : > { %v412_v7 = vor.u32 %v433_v2, %v409_v4  ;;  %v416_v8 = vor.u32 %v436_v6, %v415_v5  ;;  %v434_v9 = vld [vmem:[%s171_s16 + $0x2c] sm:$0xf]  ;;  %v417_v10 = vld [vmem:[%s171_s16 + $0x38] sm:$0xf0]  ;;  %v391_v11 = vld [vmem:[%s171_s16] sm:$0xf] }
  0x12   : > { %243 = vmatpush.bf16.msra.mxu0 %v408_v3  ;;  %v420_v12 = vor.u32 %v434_v9, %v417_v10  ;;  %v431_v13 = vld [vmem:[%s171_s16 + $0xc] sm:$0xf0]  ;;  %v429_v14 = vld [vmem:[%s171_s16 + $0x4] sm:$0xf]  ;;  %v393_v15 = vld [vmem:[%s171_s16 + $0x10] sm:$0xf0] }
  0x13   : > { %256 = vmatpush.bf16.msra.mxu1 %v412_v7  ;;  %269 = vmatpush.bf16.msra.mxu2 %v416_v8  ;;  %v392_v16 = vor.u32 %v431_v13, %v391_v11  ;;  %v396_v17 = vor.u32 %v429_v14, %v393_v15  ;;  %v399_v18 = vld [vmem:[%s171_s16 + $0x8] sm:$0xf]  ;;  %v432_v19 = vld [vmem:[%s171_s16 + $0x14] sm:$0xf0]  ;;  %v430_v20 = vld [vmem:[%s171_s16 + $0xc] sm:$0xf] }
  0x14   : > { %282 = vmatpush.bf16.msra.mxu3 %v420_v12  ;;  %v400_v21 = vor.u32 %v432_v19, %v399_v18  ;;  %v401_v22 = vld [vmem:[%s171_s16 + $0x18] sm:$0xf0] }
  0x15   : > { %v404_v23 = vor.u32 %v430_v20, %v401_v22 }
  0x16   : > { %244 = vmatpush.bf16.msra.mxu0 %v392_v16 }
  0x17   : > { %257 = vmatpush.bf16.msra.mxu1 %v396_v17  ;;  %270 = vmatpush.bf16.msra.mxu2 %v400_v21 }
  0x18   : > { %283 = vmatpush.bf16.msra.mxu3 %v404_v23 }
  0x19   : > { %421 = vmatmul.msk.bf16.vlgmr.msra.gmra.mxu0 %vm233_vm0, %v192_v24 }
  0x1a   : > { %422 = vmatmul.msk.bf16.vlgmr.msra.gmra.mxu1 %vm233_vm0, %v192_v24  ;;  %423 = vmatmul.msk.bf16.vlgmr.msra.gmra.mxu2 %vm233_vm0, %v192_v24 }
  0x1b   : > { %424 = vmatmul.msk.bf16.vlgmr.msra.gmra.mxu3 %vm233_vm0, %v192_v24 }
  0x96   : > { %v246_v25 = vpop.f32.mrf.mxu0 }
  0x97   : > { %289 = vst [vmem:[%s181_s22] sm:$0xff] %v246_v25  ;;  %v259_v26 = vpop.f32.mrf.mxu1 }
  0x98   : > { %290 = vst [vmem:[%s181_s22 + $0x8] sm:$0xff] %v259_v26 }
  0x9d   : > { %v272_v27 = vpop.f32.mrf.mxu2 }
  0x9e   : > { %291 = vst [vmem:[%s181_s22 + $0x10] sm:$0xff] %v272_v27  ;;  %v285_v28 = vpop.f32.mrf.mxu3  ;;  %v248_v29 = vpop.f32.mrf.mxu0 }
  0x9f   : > { %292 = vst [vmem:[%s181_s22 + $0x18] sm:$0xff] %v285_v28  ;;  %v261_v30 = vpop.f32.mrf.mxu1 }
  0xa5   : > { %v274_v31 = vpop.f32.mrf.mxu2 }
  0xa6   : > { %v287_v32 = vpop.f32.mrf.mxu3 }
  0xa7 PF: > { %s12_s11 = sadd.s32 1, %s483_s11   ;;  %s543_s9 = smov %s479_s10 }
  0xa8   : > { %p9_p5 = scmp.ge.s32.totalorder %s12_s11, 4   ;;  %s544_s10 = smov %s546_s12 }
  0xaa   :  { %11 = sbr.rel (!%p9_p5) target bundleno = 2 (0x2), region = 58 }

// kernel: bidirection_attention.9
= control target key start
LH: loop header
LB: loop body
LE: loop exit
PB: predicated region body
PF: predicated region fallthrough
CT: control target
= control target key end

     0   :  { %s371_s9 = smov 0   ;;  %s373_s10 = smov 0   ;;  %s400_s0 = inlined_call_operand.vmem [shape: bf16[2,32,128], index: 0, kind: input, shape index: {}]   ;;  %s401_s1 = inlined_call_operand.vmem [shape: bf16[3,32], index: 1, kind: input, shape index: {}]   ;;  %s402_s2 = inlined_call_operand.vmem [shape: f32[2,3,128], index: 2, kind: output, shape index: {}]  }
   0x1   :  { %s375_s11 = smov 0  }
   0x2 LB: > { %s24_s12 = sadd.s32 1, %s350_s10  ;;  %p290_p0 = scmp.ge.s32.totalorder %s354_s11, 1  ;;  %s354_s11 = sphi %s375_s11, %s12_s11   ;;  %s350_s10 = sphi %s373_s10, %s404_s10   ;;  %s346_s9 = sphi %s371_s9, %s403_s9  }
   0x3   : > { %p26_p1 = scmp.ge.s32.totalorder %s24_s12, 2  ;;  %p131_p2 = scmp.lt.s32.totalorder %s354_s11, 3 }
   0x5   : > { %s406_s12 = smov (%p26_p1, %s24_s12), 0  ;;  %p132_p3 = pnand %p290_p0, %p131_p2 }
   0x6   : > { %p158_p4 = scmp.lt.s32.totalorder (!%p132_p3), %s346_s9, 1 }
   0x7   : > { %135 = sbr.rel (%p132_p3) target bundleno = 157 (0x9d), region = 28 }
   0xc   : > { %s408_s9 = smov (!%p158_p4, %s346_s9), 1  ;;  %v178_v2 = vld [vmem:[%s401_s1] sm:$0x3]  ;;  %vm191_vm0 = vcmask 261120  }
   0xd   : > { %s305_s13 = sshll.u32 %s408_s9, 4  ;;  %s293_s19 = sshll.u32 %s408_s9, 2 }
   0xe   : > { %s165_s16 = scalar_lea.vmem %s400_s0, %s305_s13  ;;  %s172_s22 = scalar_lea.vmem %s402_s2, %s293_s19 }
   0xf   : > { %v307_v0 = vld [vmem:[%s165_s16 + $0x8] sm:$0xff]  ;;  %v306_v1 = vld [vmem:[%s165_s16] sm:$0xff] }
  0x10   : > { %201 = vmatpush.bf16.msra.mxu0 %v307_v0 }
  0x14   : > { %202 = vmatpush.bf16.msra.mxu0 %v306_v1 }
  0x17   : > { %302 = vmatmul.msk.bf16.vlgmr.msra.gmra.mxu0 %vm191_vm0, %v178_v2 }
  0x94   : > { %v204_v3 = vpop.f32.mrf.mxu0 }
  0x95   : > { %208 = vst [vmem:[%s172_s22] sm:$0x7] %v204_v3 }
  0x9c   : > { %v206_v4 = vpop.f32.mrf.mxu0 }
  0x9d PF: > { %s12_s11 = sadd.s32 1, %s354_s11   ;;  %s403_s9 = smov %s350_s10 }
  0x9e   : > { %p9_p5 = scmp.ge.s32.totalorder %s12_s11, 4   ;;  %s404_s10 = smov %s406_s12 }
  0xa0   :  { %11 = sbr.rel (!%p9_p5) target bundleno = 2 (0x2), region = 58 }

</bundles_post_ra>
